<compile_context>
chip_gen: v7x
topology: tpu7x:2x2x1
jax: 0.10.0
libtpu: 0.0.40
codegen_flags: <defaults>
</compile_context>

<pallas_src>
import jax
import jax.numpy as jnp
import numpy as np
from jax.experimental import pallas as pl
from jax.experimental.pallas import tpu as pltpu


def se_kernel(x_ref, w1_ref, b1_ref, w2_ref, b2_ref, out_ref):
    # x_ref: (NB, C, HWP)   w1_ref: (C, MID) pre-scaled by 1/HW   w2_ref: (MID, C)
    x = x_ref[...]                                              # input dtype, no upcast

    # AdaptiveAvgPool2d(1): f32-accumulated sum over the spatial (lane) axis.
    # The 1/HW factor is folded into w1, and zero spatial padding does not
    # change the sum.
    pooled = jnp.sum(x, axis=-1, dtype=jnp.float32)             # (NB, C)

    # Linear(C -> MID) + ReLU6   (MXU matmul, f32 accumulate)
    h1 = jnp.dot(pooled, w1_ref[...], preferred_element_type=jnp.float32) + b1_ref[...]
    h1 = jnp.clip(h1, 0.0, 6.0)

    # Linear(MID -> C) + ReLU6
    h2 = jnp.dot(h1, w2_ref[...], preferred_element_type=jnp.float32) + b2_ref[...]
    h2 = jnp.clip(h2, 0.0, 6.0)                                 # (NB, C)

    # Gate: per-(sample, channel) scale broadcast over the lane axis, in the
    # input dtype (keeps bf16 I/O at bf16 HBM bytes).
    out_ref[...] = (x * h2.astype(x.dtype)[:, :, None]).astype(out_ref.dtype)


def _vmem_capacity_bytes():
    try:
        info = pltpu.get_tpu_info()
        cap = getattr(info, "vmem_capacity_bytes", None)
        if cap:
            return int(cap)
    except Exception:
        pass
    return 64 << 20  # conservative fallback (v7x per-TC physical VMEM)


def _choose_n_block(N, per_sample_tile_bytes, vmem_cap):
    # Keep the double-buffered in+out tiles within ~40% of physical VMEM,
    # leaving headroom for weights / semaphores / compiler scratch.
    budget = int(vmem_cap * 0.4)
    cap = max(1, budget // max(per_sample_tile_bytes, 1))
    cap = min(cap, N)
    # Largest divisor of N not exceeding the cap (no megacore-driven shrinking:
    # this kernel is HBM-bound, so splitting steps buys nothing).
    for nb in range(cap, 0, -1):
        if N % nb == 0:
            return nb
    return 1


def squeeze_excite_forward(x, kernel_params, *, n_block=None):
    w1_t, b1, w2_t, b2 = kernel_params
    N, C, H, W = x.shape
    HW = H * W
    MID = w1_t.shape[1]
    assert w2_t.shape[1] == C, "SqueezeAndExcite requires out_channels == in_channels"

    # Lane-dense spatial axis: pad HW up to a multiple of 128 (zeros are exact
    # under the sum-based pooling).
    HWP = ((HW + 127) // 128) * 128
    xk = x.reshape(N, C, HW)
    if HWP != HW:
        xk = jnp.pad(xk, ((0, 0), (0, 0), (0, HWP - HW)))

    itemsize = jnp.dtype(x.dtype).itemsize
    # 2 (double buffer) * 2 (input + output) tiles per sample.
    per_sample_tile_bytes = 4 * C * HWP * itemsize
    vmem_cap = _vmem_capacity_bytes()

    if n_block is None:
        n_block = _choose_n_block(N, per_sample_tile_bytes, vmem_cap)
    assert N % n_block == 0

    weight_bytes = sum(int(np.prod(a.shape)) * jnp.dtype(a.dtype).itemsize
                       for a in (w1_t, b1, w2_t, b2))
    needed_bytes = n_block * per_sample_tile_bytes + weight_bytes + (1 << 20)

    compiler_kwargs = dict(dimension_semantics=("parallel",))
    # Only raise the scoped VMEM limit when the tiles would not fit under the
    # smallest default scoped limit (16 MiB on v5e); never exceed physical.
    if needed_bytes > (16 << 20):
        compiler_kwargs["vmem_limit_bytes"] = int(
            min(vmem_cap * 0.9, needed_bytes * 1.5))

    out = pl.pallas_call(
        se_kernel,
        out_shape=jax.ShapeDtypeStruct((N, C, HWP), x.dtype),
        grid=(N // n_block,),
        in_specs=[
            pl.BlockSpec((n_block, C, HWP), lambda n: (n, 0, 0)),
            pl.BlockSpec((C, MID), lambda n: (0, 0)),
            pl.BlockSpec((1, MID), lambda n: (0, 0)),
            pl.BlockSpec((MID, C), lambda n: (0, 0)),
            pl.BlockSpec((1, C), lambda n: (0, 0)),
        ],
        out_specs=pl.BlockSpec((n_block, C, HWP), lambda n: (n, 0, 0)),
        compiler_params=pltpu.CompilerParams(**compiler_kwargs),
    )(xk, w1_t, b1, w2_t, b2)

    if HWP != HW:
        out = out[..., :HW]
    return out.reshape(N, C, H, W)


def init_params(key, in_channels, out_channels, hw, divide=4):
    mid = in_channels // divide
    k1, k2, k3, k4 = jax.random.split(key, 4)
    W1 = jax.random.normal(k1, (mid, in_channels), jnp.float32) / np.sqrt(in_channels)
    b1 = 0.05 * jax.random.normal(k2, (mid,), jnp.float32)
    W2 = jax.random.normal(k3, (out_channels, mid), jnp.float32) / np.sqrt(mid)
    b2 = 0.05 * jax.random.normal(k4, (out_channels,), jnp.float32)

    raw = dict(W1=W1, b1=b1, W2=W2, b2=b2)
    kernel_params = (
        (W1.T / float(hw)).astype(jnp.float32),   # (C, mid), 1/HW of the mean folded in
        b1.reshape(1, mid),
        W2.T,                                      # (mid, C_out), matmul-ready
        b2.reshape(1, out_channels),
    )
    return raw, kernel_params


def reference_forward(x, raw):
    # Pure-JAX reference mirroring the PyTorch forward.
    pooled = x.mean(axis=(2, 3))                                  # (N, C)
    h1 = jnp.clip(pooled @ raw['W1'].T + raw['b1'], 0.0, 6.0)
    h2 = jnp.clip(h1 @ raw['W2'].T + raw['b2'], 0.0, 6.0)
    return x * h2[:, :, None, None]


if __name__ == "__main__":
    key = jax.random.PRNGKey(0)
    kx, kp = jax.random.split(key)

    # divide=4 -> mid_channels = 32; out_channels == in_channels so the
    # final view(b, c, 1, 1) * x of the PyTorch module is well-formed.
    N, C, H, W = 4, 128, 16, 16
    x = jax.random.normal(kx, (N, C, H, W), jnp.float32)

    raw, kernel_params = init_params(kp, in_channels=C, out_channels=C,
                                     hw=H * W, divide=4)

    out = squeeze_excite_forward(x, kernel_params)
    out = jax.block_until_ready(out)

    ref = reference_forward(x, raw)
    np.testing.assert_allclose(np.asarray(out), np.asarray(ref), rtol=1e-4, atol=1e-4)

    print("KERNEL_OK")
</pallas_src>

<mosaic_0001>
module attributes {stable_mosaic.version = 11 : i64} {
  func.func @se_kernel(%arg0: i32, %arg1: memref<4x128x256xf32, #tpu.memory_space<vmem>>, %arg2: memref<128x32xf32, #tpu.memory_space<vmem>>, %arg3: memref<1x32xf32, #tpu.memory_space<vmem>>, %arg4: memref<32x128xf32, #tpu.memory_space<vmem>>, %arg5: memref<1x128xf32, #tpu.memory_space<vmem>>, %arg6: memref<4x128x256xf32, #tpu.memory_space<vmem>>) attributes {dimension_semantics = [#tpu.dimension_semantics<parallel>], iteration_bounds = array<i64: 1>, scalar_prefetch = 0 : i64, scratch_operands = 0 : i64, tpu.core_type = #tpu.core_type<tc>, window_params = [{transform_indices = @transform_0, window_bounds = array<i64: 4, 128, 256>}, {pipeline_mode = #tpu.pipeline_mode<synchronous>, transform_indices = @transform_1, window_bounds = array<i64: 128, 32>}, {pipeline_mode = #tpu.pipeline_mode<synchronous>, transform_indices = @transform_2, window_bounds = array<i64: 1, 32>}, {pipeline_mode = #tpu.pipeline_mode<synchronous>, transform_indices = @transform_3, window_bounds = array<i64: 32, 128>}, {pipeline_mode = #tpu.pipeline_mode<synchronous>, transform_indices = @transform_4, window_bounds = array<i64: 1, 128>}, {transform_indices = @transform_5, window_bounds = array<i64: 4, 128, 256>}]} {
    %c0 = arith.constant 0 : index
    %c0_0 = arith.constant 0 : index
    %c0_1 = arith.constant 0 : index
    %0 = vector.load %arg1[%c0, %c0_0, %c0_1] : memref<4x128x256xf32, #tpu.memory_space<vmem>>, vector<4x128x256xf32>
    %cst = arith.constant dense<0.000000e+00> : vector<4x128xf32>
    %1 = vector.multi_reduction <add>, %0, %cst [2] : vector<4x128x256xf32> to vector<4x128xf32>
    %c0_2 = arith.constant 0 : index
    %c0_3 = arith.constant 0 : index
    %2 = vector.load %arg2[%c0_2, %c0_3] : memref<128x32xf32, #tpu.memory_space<vmem>>, vector<128x32xf32>
    %cst_4 = arith.constant dense<0.000000e+00> : vector<4x32xf32>
    %3 = tpu.matmul %1, %2, %cst_4 {dimension_numbers = #tpu.dot_dimension_numbers<[1], [0], [0], [1], [0, 0, 1, 1], [], []>} : vector<4x128xf32>, vector<128x32xf32>, vector<4x32xf32> -> vector<4x32xf32>
    %c0_5 = arith.constant 0 : index
    %c0_6 = arith.constant 0 : index
    %4 = vector.load %arg3[%c0_5, %c0_6] : memref<1x32xf32, #tpu.memory_space<vmem>>, vector<1x32xf32>
    %5 = vector.broadcast %4 : vector<1x32xf32> to vector<4x32xf32>
    %6 = arith.addf %3, %5 : vector<4x32xf32>
    %cst_7 = arith.constant 0.000000e+00 : f32
    %cst_8 = arith.constant 6.000000e+00 : f32
    %7 = vector.broadcast %cst_7 : f32 to vector<4x32xf32>
    %8 = arith.maximumf %7, %6 : vector<4x32xf32>
    %9 = vector.broadcast %cst_8 : f32 to vector<4x32xf32>
    %10 = arith.minimumf %9, %8 : vector<4x32xf32>
    %c0_9 = arith.constant 0 : index
    %c0_10 = arith.constant 0 : index
    %11 = vector.load %arg4[%c0_9, %c0_10] : memref<32x128xf32, #tpu.memory_space<vmem>>, vector<32x128xf32>
    %cst_11 = arith.constant dense<0.000000e+00> : vector<4x128xf32>
    %12 = tpu.matmul %10, %11, %cst_11 {dimension_numbers = #tpu.dot_dimension_numbers<[1], [0], [0], [1], [0, 0, 1, 1], [], []>} : vector<4x32xf32>, vector<32x128xf32>, vector<4x128xf32> -> vector<4x128xf32>
    %c0_12 = arith.constant 0 : index
    %c0_13 = arith.constant 0 : index
    %13 = vector.load %arg5[%c0_12, %c0_13] : memref<1x128xf32, #tpu.memory_space<vmem>>, vector<1x128xf32>
    %14 = vector.broadcast %13 : vector<1x128xf32> to vector<4x128xf32>
    %15 = arith.addf %12, %14 : vector<4x128xf32>
    %cst_14 = arith.constant 0.000000e+00 : f32
    %cst_15 = arith.constant 6.000000e+00 : f32
    %16 = vector.broadcast %cst_14 : f32 to vector<4x128xf32>
    %17 = arith.maximumf %16, %15 : vector<4x128xf32>
    %18 = vector.broadcast %cst_15 : f32 to vector<4x128xf32>
    %19 = arith.minimumf %18, %17 : vector<4x128xf32>
    %20 = vector.shape_cast %19 : vector<4x128xf32> to vector<4x128x1xf32>
    %21 = vector.broadcast %20 : vector<4x128x1xf32> to vector<4x128x256xf32>
    %22 = arith.mulf %0, %21 : vector<4x128x256xf32>
    %c0_16 = arith.constant 0 : index
    %c0_17 = arith.constant 0 : index
    %c0_18 = arith.constant 0 : index
    %23 = vector.load %arg6[%c0_16, %c0_17, %c0_18] : memref<4x128x256xf32, #tpu.memory_space<vmem>>, vector<4x128x256xf32>
    tpu.vector_store %arg6[%c0_16, %c0_17, %c0_18], %22 {strides = array<i32>} : memref<4x128x256xf32, #tpu.memory_space<vmem>>, vector<4x128x256xf32>,
    return
  }
  func.func @transform_0(%arg0: i32) -> (i32, i32, i32) {
    %c0_i32 = arith.constant 0 : i32
    %c0_i32_0 = arith.constant 0 : i32
    %c0_i32_1 = arith.constant 0 : i32
    return %arg0, %c0_i32, %c0_i32_0 : i32, i32, i32
  }
  func.func @transform_1(%arg0: i32) -> (i32, i32) {
    %c0_i32 = arith.constant 0 : i32
    %c0_i32_0 = arith.constant 0 : i32
    %c0_i32_1 = arith.constant 0 : i32
    return %c0_i32, %c0_i32_0 : i32, i32
  }
  func.func @transform_2(%arg0: i32) -> (i32, i32) {
    %c0_i32 = arith.constant 0 : i32
    %c0_i32_0 = arith.constant 0 : i32
    %c0_i32_1 = arith.constant 0 : i32
    return %c0_i32, %c0_i32_0 : i32, i32
  }
  func.func @transform_3(%arg0: i32) -> (i32, i32) {
    %c0_i32 = arith.constant 0 : i32
    %c0_i32_0 = arith.constant 0 : i32
    %c0_i32_1 = arith.constant 0 : i32
    return %c0_i32, %c0_i32_0 : i32, i32
  }
  func.func @transform_4(%arg0: i32) -> (i32, i32) {
    %c0_i32 = arith.constant 0 : i32
    %c0_i32_0 = arith.constant 0 : i32
    %c0_i32_1 = arith.constant 0 : i32
    return %c0_i32, %c0_i32_0 : i32, i32
  }
  func.func @transform_5(%arg0: i32) -> (i32, i32, i32) {
    %c0_i32 = arith.constant 0 : i32
    %c0_i32_0 = arith.constant 0 : i32
    %c0_i32_1 = arith.constant 0 : i32
    return %arg0, %c0_i32, %c0_i32_0 : i32, i32, i32
  }
}

</mosaic_0001>

<bundles_post_ra>
// kernel: tpu_custom_call.1
= control target key start
LH: loop header
LB: loop body
LE: loop exit
PB: predicated region body
PF: predicated region fallthrough
CT: control target
= control target key end

     0   :  { %10 = vsyncpa [#allocation3], 0  ;;  %s2299_s0 = inlined_call_operand.hbm [shape: f32[4,128,256], index: 0, kind: input, shape index: {}]   ;;  %s2300_s1 = inlined_call_operand.vmem [shape: f32[128,32], index: 1, kind: input, shape index: {}]   ;;  %s2301_s2 = inlined_call_operand.vmem [shape: f32[1,32], index: 2, kind: input, shape index: {}]   ;;  %s2302_s3 = inlined_call_operand.vmem [shape: f32[32,128], index: 3, kind: input, shape index: {}]   ;;  %s2303_s4 = inlined_call_operand.vmem [shape: f32[1,128], index: 4, kind: input, shape index: {}]   ;;  %s2304_s5 = inlined_call_operand.hbm [shape: f32[4,128,256], index: 5, kind: output, shape index: {}]  }
   0x1   :  { %11 = vsyncpa [#allocation4], 0  ;;  %s1777_s18 = smov [#allocation2]   ;;  %s1729_s22 = scalar_lea.hbm %s2299_s0, 16384 }
   0x2   :  { %s17_s19 = sshll.u32 %s1777_s18, 4  ;;  %p1730_p0 = scmp.ne.s32.totalorder %s2299_s0, %s1729_s22  ;;  %s18_s19 = int_to_ptr.vmem [resolvable:$true] %s17_s19 }
   0x3   :  { %p1733_p1 = scmp.lt.u32.totalorder %s1729_s22, %s2299_s0 }
   0x5   :  { %p1735_p2 = pnand %p1733_p1, %p1730_p0 }
   0x7   :  { %1738 = shalt.err (!%p1735_p2)
}
   0x8   :  { %s1739_s27 = scalar_lea.vmem %s18_s19, 16384  ;;  %p1744_p4 = scmp.lt.s32.totalorder %s18_s19, %s18_s19 }
   0x9   :  { %p1740_p3 = scmp.ne.s32.totalorder %s18_s19, %s1739_s27  ;;  %p1745_p5 = scmp.lt.s32.totalorder %s1739_s27, %s1739_s27 }
   0xb   :  { %p1746_p6 = por %p1745_p5, %p1744_p4 }
   0xd   :  { %p1747_p7 = pnand %p1746_p6, %p1740_p3 }
   0xf   :  { %1750 = shalt.err (!%p1747_p7)
}
  0x10   :  { %s1778_s28 = smov 256   ;;  %s1779_s29 = smov 16  }
  0x11   :  { %23 = dma.hbm_to_vmem [thread:$0]  %s2299_s0, 16384, %s18_s19, [#allocation3], %s1778_s28, %s1778_s28, %s1779_s29  }
  0x12   :  { %1773 = dma.done.wait [#allocation3], 16384  }
  0x13   :  { %1774 = vsyncadd [#allocation3], 4294950912  ;;  %v67_v0 = vld [vmem:[#allocation2 + $0x100] sm:$0xff]  ;;  %v68_v1 = vld [vmem:[#allocation2 + $0x108] sm:$0xff]  ;;  %vm1781_vm0 = vmmov 0   ;;  %vm453_vm1 = vcmask 130112  }
  0x14   :  { %v35_v2 = vld [vmem:[#allocation2] sm:$0xff]  ;;  %v211_v3 = vadd.f32 %v68_v1, %v67_v0  ;;  %v36_v4 = vld [vmem:[#allocation2 + $0x8] sm:$0xff]  ;;  %v69_v5 = vld [vmem:[#allocation2 + $0x110] sm:$0xff]  ;;  %vm460_vm2 = vcmask 195712   ;;  %vm467_vm3 = vcmask 261312   ;;  %vm474_vm4 = vcmask 326912  }
  0x15   :  { %v70_v6 = vld [vmem:[#allocation2 + $0x118] sm:$0xff]  ;;  %v163_v7 = vadd.f32 %v36_v4, %v35_v2  ;;  %v37_v8 = vld [vmem:[#allocation2 + $0x10] sm:$0xff]  ;;  %v71_v12 = vld [vmem:[#allocation2 + $0x120] sm:$0xff]  ;;  %vm481_vm5 = vcmask 392512   ;;  %vm488_vm6 = vcmask 458112   ;;  %vm495_vm7 = vcmask 523712  }
  0x16   :  { %v38_v9 = vld [vmem:[#allocation2 + $0x18] sm:$0xff]  ;;  %212 = vadd.xlane.f32.xlu1 %v211_v3  ;;  %v214_v10 = vadd.f32 %v70_v6, %v69_v5  ;;  %v72_v13 = vld [vmem:[#allocation2 + $0x128] sm:$0xff]  ;;  %v39_v14 = vld [vmem:[#allocation2 + $0x20] sm:$0xff]  ;;  %vm502_vm8 = vcmask 589312   ;;  %vm509_vm9 = vcmask 654912   ;;  %vm516_vm10 = vcmask 720512  }
  0x17   :  { %164 = vadd.xlane.f32.xlu0 %v163_v7  ;;  %v166_v11 = vadd.f32 %v38_v9, %v37_v8  ;;  %v40_v15 = vld [vmem:[#allocation2 + $0x28] sm:$0xff]  ;;  %v217_v16 = vadd.f32 %v72_v13, %v71_v12  ;;  %v101_v18 = vld [vmem:[#allocation2 + $0x210] sm:$0xff]  ;;  %v102_v19 = vld [vmem:[#allocation2 + $0x218] sm:$0xff]  ;;  %vm523_vm11 = vcmask 786112   ;;  %vm530_vm12 = vcmask 851712  }
  0x18   :  { %v169_v17 = vadd.f32 %v40_v15, %v39_v14  ;;  %v99_v20 = vld [vmem:[#allocation2 + $0x200] sm:$0xff]  ;;  %v100_v21 = vld [vmem:[#allocation2 + $0x208] sm:$0xff]  ;;  %v262_v22 = vadd.f32 %v102_v19, %v101_v18  ;;  %v73_v24 = vld [vmem:[#allocation2 + $0x130] sm:$0xff]  ;;  %vm537_vm13 = vcmask 917312   ;;  %vm544_vm14 = vcmask 982912  }
  0x19   :  { %v259_v23 = vadd.f32 %v100_v21, %v99_v20  ;;  %v74_v25 = vld [vmem:[#allocation2 + $0x138] sm:$0xff]  ;;  %v41_v26 = vld [vmem:[#allocation2 + $0x30] sm:$0xff]  ;;  %v131_v30 = vld [vmem:[#allocation2 + $0x300] sm:$0xff]  ;;  %vm551_vm15 = vcmask 1048512  }
  0x1a   :  { %215 = vadd.xlane.f32.xlu1 %v214_v10  ;;  %v42_v27 = vld [vmem:[#allocation2 + $0x38] sm:$0xff]  ;;  %v220_v28 = vadd.f32 %v74_v25, %v73_v24  ;;  %v132_v31 = vld [vmem:[#allocation2 + $0x308] sm:$0xff]  ;;  %v103_v32 = vld [vmem:[#allocation2 + $0x220] sm:$0xff] }
  0x1b   :  { %167 = vadd.xlane.f32.xlu0 %v166_v11  ;;  %v172_v29 = vadd.f32 %v42_v27, %v41_v26  ;;  %v104_v33 = vld [vmem:[#allocation2 + $0x228] sm:$0xff]  ;;  %v307_v34 = vadd.f32 %v132_v31, %v131_v30  ;;  %v43_v36 = vld [vmem:[#allocation2 + $0x40] sm:$0xff]  ;;  %v133_v38 = vld [vmem:[#allocation2 + $0x310] sm:$0xff] }
  0x1c   :  { %v265_v35 = vadd.f32 %v104_v33, %v103_v32  ;;  %v44_v37 = vld [vmem:[#allocation2 + $0x48] sm:$0xff]  ;;  %v134_v39 = vld [vmem:[#allocation2 + $0x318] sm:$0xff]  ;;  %v105_v42 = vld [vmem:[#allocation2 + $0x230] sm:$0xff] }
  0x1d   :  { %v175_v40 = vadd.f32 %v44_v37, %v43_v36  ;;  %v310_v41 = vadd.f32 %v134_v39, %v133_v38  ;;  %v106_v43 = vld [vmem:[#allocation2 + $0x238] sm:$0xff]  ;;  %v75_v44 = vld [vmem:[#allocation2 + $0x140] sm:$0xff]  ;;  %v76_v45 = vld [vmem:[#allocation2 + $0x148] sm:$0xff] }
  0x1e   :  { %218 = vadd.xlane.f32.xlu1 %v217_v16  ;;  %v268_v46 = vadd.f32 %v106_v43, %v105_v42  ;;  %v223_v47 = vadd.f32 %v76_v45, %v75_v44  ;;  %v45_v48 = vld [vmem:[#allocation2 + $0x50] sm:$0xff]  ;;  %v46_v49 = vld [vmem:[#allocation2 + $0x58] sm:$0xff]  ;;  %v135_v50 = vld [vmem:[#allocation2 + $0x320] sm:$0xff] }
  0x1f   :  { %170 = vadd.xlane.f32.xlu0 %v169_v17  ;;  %v136_v51 = vld [vmem:[#allocation2 + $0x328] sm:$0xff]  ;;  %v178_v52 = vadd.f32 %v46_v49, %v45_v48  ;;  %v107_v54 = vld [vmem:[#allocation2 + $0x240] sm:$0xff]  ;;  %v77_v56 = vld [vmem:[#allocation2 + $0x150] sm:$0xff] }
  0x20   :  { %v313_v53 = vadd.f32 %v136_v51, %v135_v50  ;;  %v108_v55 = vld [vmem:[#allocation2 + $0x248] sm:$0xff]  ;;  %v78_v57 = vld [vmem:[#allocation2 + $0x158] sm:$0xff]  ;;  %v47_v60 = vld [vmem:[#allocation2 + $0x60] sm:$0xff] }
  0x21   :  { %v271_v58 = vadd.f32 %v108_v55, %v107_v54  ;;  %v226_v59 = vadd.f32 %v78_v57, %v77_v56  ;;  %v48_v61 = vld [vmem:[#allocation2 + $0x68] sm:$0xff]  ;;  %v137_v62 = vld [vmem:[#allocation2 + $0x330] sm:$0xff]  ;;  %v138_v63 = vld [vmem:[#allocation2 + $0x338] sm:$0xff] }
  0x22   :  { %263 = vadd.xlane.f32.xlu1 %v262_v22  ;;  %v181_v0 = vadd.f32 %v48_v61, %v47_v60  ;;  %v316_v1 = vadd.f32 %v138_v63, %v137_v62  ;;  %v109_v2 = vld [vmem:[#allocation2 + $0x250] sm:$0xff]  ;;  %v110_v3 = vld [vmem:[#allocation2 + $0x258] sm:$0xff]  ;;  %v79_v4 = vld [vmem:[#allocation2 + $0x160] sm:$0xff] }
  0x23   :  { %260 = vadd.xlane.f32.xlu0 %v259_v23  ;;  %v80_v5 = vld [vmem:[#allocation2 + $0x168] sm:$0xff]  ;;  %v274_v6 = vadd.f32 %v110_v3, %v109_v2  ;;  %v49_v8 = vld [vmem:[#allocation2 + $0x70] sm:$0xff]  ;;  %v50_v9 = vld [vmem:[#allocation2 + $0x78] sm:$0xff] }
  0x24   :  { %v229_v7 = vadd.f32 %v80_v5, %v79_v4  ;;  %v139_v10 = vld [vmem:[#allocation2 + $0x340] sm:$0xff]  ;;  %v140_v11 = vld [vmem:[#allocation2 + $0x348] sm:$0xff]  ;;  %v184_v12 = vadd.f32 %v50_v9, %v49_v8  ;;  %v81_v16 = vld [vmem:[#allocation2 + $0x170] sm:$0xff] }
  0x25   :  { %v319_v13 = vadd.f32 %v140_v11, %v139_v10  ;;  %v111_v14 = vld [vmem:[#allocation2 + $0x260] sm:$0xff]  ;;  %v112_v15 = vld [vmem:[#allocation2 + $0x268] sm:$0xff]  ;;  %v82_v17 = vld [vmem:[#allocation2 + $0x178] sm:$0xff] }
  0x26   :  { %221 = vadd.xlane.f32.xlu1 %v220_v28  ;;  %v277_v18 = vadd.f32 %v112_v15, %v111_v14  ;;  %v232_v19 = vadd.f32 %v82_v17, %v81_v16  ;;  %v51_v20 = vld [vmem:[#allocation2 + $0x80] sm:$0xff]  ;;  %v52_v21 = vld [vmem:[#allocation2 + $0x88] sm:$0xff]  ;;  %v141_v22 = vld [vmem:[#allocation2 + $0x350] sm:$0xff] }
  0x27   :  { %173 = vadd.xlane.f32.xlu0 %v172_v29  ;;  %v142_v23 = vld [vmem:[#allocation2 + $0x358] sm:$0xff]  ;;  %v187_v24 = vadd.f32 %v52_v21, %v51_v20  ;;  %v113_v26 = vld [vmem:[#allocation2 + $0x270] sm:$0xff]  ;;  %v83_v28 = vld [vmem:[#allocation2 + $0x180] sm:$0xff] }
  0x28   :  { %v322_v25 = vadd.f32 %v142_v23, %v141_v22  ;;  %v114_v27 = vld [vmem:[#allocation2 + $0x278] sm:$0xff]  ;;  %v84_v29 = vld [vmem:[#allocation2 + $0x188] sm:$0xff]  ;;  %v53_v32 = vld [vmem:[#allocation2 + $0x90] sm:$0xff] }
  0x29   :  { %v280_v30 = vadd.f32 %v114_v27, %v113_v26  ;;  %v235_v31 = vadd.f32 %v84_v29, %v83_v28  ;;  %v54_v33 = vld [vmem:[#allocation2 + $0x98] sm:$0xff]  ;;  %v115_v38 = vld [vmem:[#allocation2 + $0x280] sm:$0xff]  ;;  %v116_v39 = vld [vmem:[#allocation2 + $0x288] sm:$0xff] }
  0x2a   :  { %308 = vadd.xlane.f32.xlu1 %v307_v34  ;;  %v143_v34 = vld [vmem:[#allocation2 + $0x360] sm:$0xff]  ;;  %v190_v36 = vadd.f32 %v54_v33, %v53_v32  ;;  %v283_v42 = vadd.f32 %v116_v39, %v115_v38  ;;  %v56_v45 = vld [vmem:[#allocation2 + $0xa8] sm:$0xff]  ;;  %v117_v50 = vld [vmem:[#allocation2 + $0x290] sm:$0xff] }
  0x2b   :  { %266 = vadd.xlane.f32.xlu0 %v265_v35  ;;  %v144_v35 = vld [vmem:[#allocation2 + $0x368] sm:$0xff]  ;;  %v55_v44 = vld [vmem:[#allocation2 + $0xa0] sm:$0xff]  ;;  %v118_v51 = vld [vmem:[#allocation2 + $0x298] sm:$0xff] }
  0x2c   :  { %v325_v37 = vadd.f32 %v144_v35, %v143_v34  ;;  %v193_v48 = vadd.f32 %v56_v45, %v55_v44  ;;  %v286_v54 = vadd.f32 %v118_v51, %v117_v50  ;;  %v57_v56 = vld [vmem:[#allocation2 + $0xb0] sm:$0xff]  ;;  %v58_v57 = vld [vmem:[#allocation2 + $0xb8] sm:$0xff]  ;;  %v119_v62 = vld [vmem:[#allocation2 + $0x2a0] sm:$0xff] }
  0x2d   :  { %v196_v60 = vadd.f32 %v58_v57, %v57_v56  ;;  %v120_v63 = vld [vmem:[#allocation2 + $0x2a8] sm:$0xff]  ;;  %v59_v4 = vld [vmem:[#allocation2 + $0xc0] sm:$0xff]  ;;  %v121_v10 = vld [vmem:[#allocation2 + $0x2b0] sm:$0xff] }
  0x2e   :  { %176 = vadd.xlane.f32.xlu1 %v175_v40  ;;  %v85_v40 = vld [vmem:[#allocation2 + $0x190] sm:$0xff]  ;;  %v289_v2 = vadd.f32 %v120_v63, %v119_v62  ;;  %v60_v5 = vld [vmem:[#allocation2 + $0xc8] sm:$0xff]  ;;  %v122_v11 = vld [vmem:[#allocation2 + $0x2b8] sm:$0xff] }
  0x2f   :  { %311 = vadd.xlane.f32.xlu0 %v310_v41  ;;  %v86_v41 = vld [vmem:[#allocation2 + $0x198] sm:$0xff]  ;;  %v199_v8 = vadd.f32 %v60_v5, %v59_v4  ;;  %v292_v14 = vadd.f32 %v122_v11, %v121_v10  ;;  %v61_v16 = vld [vmem:[#allocation2 + $0xd0] sm:$0xff]  ;;  %v123_v22 = vld [vmem:[#allocation2 + $0x2c0] sm:$0xff] }
  0x30   :  { %v238_v43 = vadd.f32 %v86_v41, %v85_v40  ;;  %v62_v17 = vld [vmem:[#allocation2 + $0xd8] sm:$0xff]  ;;  %v124_v23 = vld [vmem:[#allocation2 + $0x2c8] sm:$0xff]  ;;  %v1829_v28 = vld [vmem:[#allocation2 + $0xe0] sm:$0xff] }
  0x31   :  { %v202_v20 = vadd.f32 %v62_v17, %v61_v16  ;;  %v295_v26 = vadd.f32 %v124_v23, %v123_v22  ;;  %2311 = vst [vmem:[#allocation8_spill] sm:$0xff] %v1829_v28  ;;  %v1831_v29 = vld [vmem:[#allocation2 + $0xe8] sm:$0xff]  ;;  %v125_v34 = vld [vmem:[#allocation2 + $0x2d0] sm:$0xff]  ;;  %v126_v35 = vld [vmem:[#allocation2 + $0x2d8] sm:$0xff] }
  0x32   :  { %269 = vadd.xlane.f32.xlu1 %v268_v46  ;;  %v145_v46 = vld [vmem:[#allocation2 + $0x370] sm:$0xff]  ;;  %2312 = vst [vmem:[#allocation9_spill] sm:$0xff] %v1831_v29  ;;  %v205_v32 = vadd.f32 %v1831_v29, %v1829_v28  ;;  %v298_v38 = vadd.f32 %v126_v35, %v125_v34  ;;  %v1837_v41 = vld [vmem:[#allocation2 + $0xf8] sm:$0xff]  ;;  %v355_v50 = vld [vmem:[%s2300_s1] sm:$0xff] }
  0x33   :  { %224 = vadd.xlane.f32.xlu0 %v223_v47  ;;  %v146_v47 = vld [vmem:[#allocation2 + $0x378] sm:$0xff]  ;;  %v1835_v40 = vld [vmem:[#allocation2 + $0xf0] sm:$0xff]  ;;  %2314 = vst [vmem:[#allocation11_spill] sm:$0xff] %v1837_v41  ;;  %v356_v51 = vld [vmem:[%s2300_s1 + $0x8] sm:$0xff] }
  0x34   :  { %v328_v49 = vadd.f32 %v146_v47, %v145_v46  ;;  %2313 = vst [vmem:[#allocation10_spill] sm:$0xff] %v1835_v40  ;;  %v208_v44 = vadd.f32 %v1837_v41, %v1835_v40  ;;  %v127_v46 = vld [vmem:[#allocation2 + $0x2e0] sm:$0xff]  ;;  %v128_v47 = vld [vmem:[#allocation2 + $0x2e8] sm:$0xff]  ;;  %v129_v56 = vld [vmem:[#allocation2 + $0x2f0] sm:$0xff] }
  0x35   :  { %v130_v57 = vld [vmem:[#allocation2 + $0x2f8] sm:$0xff]  ;;  %v160_v4 = vld [vmem:[#allocation2 + $0x3e8] sm:$0xff]  ;;  %v359_v5 = vld [vmem:[%s2300_s1 + $0x20] sm:$0xff] }
  0x36   :  { %179 = vadd.xlane.f32.xlu1 %v178_v52  ;;  %v87_v52 = vld [vmem:[#allocation2 + $0x1a0] sm:$0xff]  ;;  %v304_v63 = vadd.f32 %v130_v57, %v129_v56  ;;  %v361_v10 = vld [vmem:[%s2300_s1 + $0x30] sm:$0xff]  ;;  %v362_v11 = vld [vmem:[%s2300_s1 + $0x38] sm:$0xff] }
  0x37   :  { %314 = vadd.xlane.f32.xlu0 %v313_v53  ;;  %v88_v53 = vld [vmem:[#allocation2 + $0x1a8] sm:$0xff]  ;;  %v365_v16 = vld [vmem:[%s2300_s1 + $0x50] sm:$0xff]  ;;  %v366_v17 = vld [vmem:[%s2300_s1 + $0x58] sm:$0xff] }
  0x38   :  { %v241_v55 = vadd.f32 %v88_v53, %v87_v52  ;;  %v1569_v52 = vpack.c.bf16 %v356_v51, %v355_v50  ;;  %v301_v53 = vadd.f32 %v128_v47, %v127_v46  ;;  %v369_v22 = vld [vmem:[%s2300_s1 + $0x70] sm:$0xff]  ;;  %v370_v23 = vld [vmem:[%s2300_s1 + $0x78] sm:$0xff] }
  0x3a   :  { %272 = vadd.xlane.f32.xlu1 %v271_v58  ;;  %v147_v58 = vld [vmem:[#allocation2 + $0x380] sm:$0xff] }
  0x3b   :  { %227 = vadd.xlane.f32.xlu0 %v226_v59  ;;  %v148_v59 = vld [vmem:[#allocation2 + $0x388] sm:$0xff] }
  0x3c   :  { %v331_v61 = vadd.f32 %v148_v59, %v147_v58  ;;  %v157_v58 = vld [vmem:[#allocation2 + $0x3d0] sm:$0xff]  ;;  %v158_v59 = vld [vmem:[#allocation2 + $0x3d8] sm:$0xff] }
  0x3e   :  { %182 = vadd.xlane.f32.xlu1 %v181_v0  ;;  %v89_v0 = vld [vmem:[#allocation2 + $0x1b0] sm:$0xff] }
  0x3f   :  { %317 = vadd.xlane.f32.xlu0 %v316_v1  ;;  %v90_v1 = vld [vmem:[#allocation2 + $0x1b8] sm:$0xff] }
  0x40   :  { %v244_v3 = vadd.f32 %v90_v1, %v89_v0  ;;  %v346_v0 = vadd.f32 %v158_v59, %v157_v58  ;;  %v159_v1 = vld [vmem:[#allocation2 + $0x3e0] sm:$0xff] }
  0x42   :  { %275 = vadd.xlane.f32.xlu1 %v274_v6  ;;  %v149_v6 = vld [vmem:[#allocation2 + $0x390] sm:$0xff] }
  0x43   :  { %230 = vadd.xlane.f32.xlu0 %v229_v7  ;;  %v150_v7 = vld [vmem:[#allocation2 + $0x398] sm:$0xff] }
  0x44   :  { %v334_v9 = vadd.f32 %v150_v7, %v149_v6  ;;  %v360_v6 = vld [vmem:[%s2300_s1 + $0x28] sm:$0xff] }
  0x45   :  { %v1575_v7 = vpack.c.bf16 %v360_v6, %v359_v5 }
  0x46   :  { %185 = vadd.xlane.f32.xlu1 %v184_v12  ;;  %v91_v12 = vld [vmem:[#allocation2 + $0x1c0] sm:$0xff] }
  0x47   :  { %320 = vadd.xlane.f32.xlu0 %v319_v13  ;;  %v92_v13 = vld [vmem:[#allocation2 + $0x1c8] sm:$0xff] }
  0x48   :  { %v247_v15 = vadd.f32 %v92_v13, %v91_v12  ;;  %v1578_v12 = vpack.c.bf16 %v362_v11, %v361_v10  ;;  %v363_v13 = vld [vmem:[%s2300_s1 + $0x40] sm:$0xff] }
  0x4a   :  { %278 = vadd.xlane.f32.xlu1 %v277_v18  ;;  %v151_v18 = vld [vmem:[#allocation2 + $0x3a0] sm:$0xff] }
  0x4b   :  { %233 = vadd.xlane.f32.xlu0 %v232_v19  ;;  %v152_v19 = vld [vmem:[#allocation2 + $0x3a8] sm:$0xff] }
  0x4c   :  { %v337_v21 = vadd.f32 %v152_v19, %v151_v18  ;;  %v1584_v18 = vpack.c.bf16 %v366_v17, %v365_v16  ;;  %v367_v19 = vld [vmem:[%s2300_s1 + $0x60] sm:$0xff] }
  0x4e   :  { %188 = vadd.xlane.f32.xlu1 %v187_v24  ;;  %v93_v24 = vld [vmem:[#allocation2 + $0x1d0] sm:$0xff] }
  0x4f   :  { %323 = vadd.xlane.f32.xlu0 %v322_v25  ;;  %v94_v25 = vld [vmem:[#allocation2 + $0x1d8] sm:$0xff] }
  0x50   :  { %v250_v27 = vadd.f32 %v94_v25, %v93_v24  ;;  %v1590_v24 = vpack.c.bf16 %v370_v23, %v369_v22 }
  0x52   :  { %281 = vadd.xlane.f32.xlu1 %v280_v30  ;;  %v153_v30 = vld [vmem:[#allocation2 + $0x3b0] sm:$0xff] }
  0x53   :  { %236 = vadd.xlane.f32.xlu0 %v235_v31  ;;  %v154_v31 = vld [vmem:[#allocation2 + $0x3b8] sm:$0xff] }
  0x54   :  { %v340_v33 = vadd.f32 %v154_v31, %v153_v30 }
  0x56   :  { %191 = vadd.xlane.f32.xlu1 %v190_v36  ;;  %v95_v36 = vld [vmem:[#allocation2 + $0x1e0] sm:$0xff] }
  0x57   :  { %326 = vadd.xlane.f32.xlu0 %v325_v37  ;;  %v96_v37 = vld [vmem:[#allocation2 + $0x1e8] sm:$0xff] }
  0x58   :  { %v253_v39 = vadd.f32 %v96_v37, %v95_v36 }
  0x5a   :  { %284 = vadd.xlane.f32.xlu1 %v283_v42  ;;  %v155_v42 = vld [vmem:[#allocation2 + $0x3c0] sm:$0xff] }
  0x5b   :  { %239 = vadd.xlane.f32.xlu0 %v238_v43  ;;  %v156_v43 = vld [vmem:[#allocation2 + $0x3c8] sm:$0xff] }
  0x5c   :  { %v343_v45 = vadd.f32 %v156_v43, %v155_v42 }
  0x5e   :  { %194 = vadd.xlane.f32.xlu1 %v193_v48  ;;  %v97_v48 = vld [vmem:[#allocation2 + $0x1f0] sm:$0xff] }
  0x5f   :  { %329 = vadd.xlane.f32.xlu0 %v328_v49  ;;  %v98_v49 = vld [vmem:[#allocation2 + $0x1f8] sm:$0xff] }
  0x62   :  { %287 = vadd.xlane.f32.xlu1 %v286_v54  ;;  %v2305_v54 = vmov 0.0|0.0  }
  0x63   :  { %242 = vadd.xlane.f32.xlu0 %v241_v55  ;;  %1568 = vmatprep.subr.bf16.mxu0 %v2305_v54  ;;  %v256_v55 = vadd.f32 %v98_v49, %v97_v48 }
  0x64   :  { %1570 = vmatpush3.bf16.msra.mxu0 %v1569_v52  ;;  %1592 = vmatprep.subr.bf16.mxu1 %v2305_v54 }
  0x65   :  { %1571 = vmatprep.subr.bf16.mxu0 %v2305_v54 }
  0x66   :  { %197 = vadd.xlane.f32.xlu1 %v196_v60  ;;  %v357_v60 = vld [vmem:[%s2300_s1 + $0x10] sm:$0xff] }
  0x67   :  { %332 = vadd.xlane.f32.xlu0 %v331_v61  ;;  %v358_v61 = vld [vmem:[%s2300_s1 + $0x18] sm:$0xff] }
  0x68   :  { %v1572_v62 = vpack.c.bf16 %v358_v61, %v357_v60 }
  0x6a   :  { %290 = vadd.xlane.f32.xlu1 %v289_v2  ;;  %v161_v2 = vld [vmem:[#allocation2 + $0x3f0] sm:$0xff]  ;;  %1573 = vmatpush3.bf16.msra.mxu0 %v1572_v62 }
  0x6b   :  { %245 = vadd.xlane.f32.xlu0 %v244_v3  ;;  %v162_v3 = vld [vmem:[#allocation2 + $0x3f8] sm:$0xff]  ;;  %1574 = vmatprep.subr.bf16.mxu0 %v2305_v54 }
  0x6e   :  { %200 = vadd.xlane.f32.xlu1 %v199_v8  ;;  %v352_v8 = vadd.f32 %v162_v3, %v161_v2  ;;  %1576 = vmatpush3.bf16.msra.mxu0 %v1575_v7 }
  0x6f   :  { %335 = vadd.xlane.f32.xlu0 %v334_v9  ;;  %v349_v9 = vadd.f32 %v160_v4, %v159_v1  ;;  %1577 = vmatprep.subr.bf16.mxu0 %v2305_v54 }
  0x72   :  { %293 = vadd.xlane.f32.xlu1 %v292_v14  ;;  %1579 = vmatpush3.bf16.msra.mxu0 %v1578_v12  ;;  %v364_v14 = vld [vmem:[%s2300_s1 + $0x48] sm:$0xff] }
  0x73   :  { %248 = vadd.xlane.f32.xlu0 %v247_v15  ;;  %1580 = vmatprep.subr.bf16.mxu0 %v2305_v54  ;;  %v1581_v15 = vpack.c.bf16 %v364_v14, %v363_v13 }
  0x76   :  { %203 = vadd.xlane.f32.xlu1 %v202_v20  ;;  %1582 = vmatpush3.bf16.msra.mxu0 %v1581_v15  ;;  %v368_v20 = vld [vmem:[%s2300_s1 + $0x68] sm:$0xff] }
  0x77   :  { %338 = vadd.xlane.f32.xlu0 %v337_v21  ;;  %1583 = vmatprep.subr.bf16.mxu0 %v2305_v54  ;;  %v1587_v21 = vpack.c.bf16 %v368_v20, %v367_v19 }
  0x7a   :  { %296 = vadd.xlane.f32.xlu1 %v295_v26  ;;  %1585 = vmatpush3.bf16.msra.mxu0 %v1584_v18 }
  0x7b   :  { %251 = vadd.xlane.f32.xlu0 %v250_v27  ;;  %1586 = vmatprep.subr.bf16.mxu0 %v2305_v54  ;;  %v1782_v27 = vmov 0.0  }
  0x7c   :  { %1554 = vmatprep.mubr.msk.f32.mxu0 %vm1781_vm0, %v1782_v27  ;;  %1565 = vmatprep.mubr.msk.f32.mxu1 %vm1781_vm0, %v1782_v27  ;;  %vm790_vm0 = vcmask 1041409  }
  0x7e   :  { %206 = vadd.xlane.f32.xlu1 %v205_v32  ;;  %1588 = vmatpush3.bf16.msra.mxu0 %v1587_v21 }
  0x7f   :  { %341 = vadd.xlane.f32.xlu0 %v340_v33  ;;  %1589 = vmatprep.subr.bf16.mxu0 %v2305_v54 }
  0x82   :  { %299 = vadd.xlane.f32.xlu1 %v298_v38  ;;  %1591 = vmatpush3.bf16.msra.mxu0 %v1590_v24 }
  0x83   :  { %254 = vadd.xlane.f32.xlu0 %v253_v39 }
  0x86   :  { %209 = vadd.xlane.f32.xlu1 %v208_v44 }
  0x87   :  { %344 = vadd.xlane.f32.xlu0 %v343_v45 }
  0x8a   :  { %302 = vadd.xlane.f32.xlu1 %v301_v53 }
  0x8b   :  { %257 = vadd.xlane.f32.xlu0 %v256_v55 }
  0x8e   :  { %305 = vadd.xlane.f32.xlu1 %v304_v63 }
  0x8f   :  { %347 = vadd.xlane.f32.xlu0 %v346_v0 }
  0x92   :  { %353 = vadd.xlane.f32.xlu1 %v352_v8  ;;  %v442_v8 = vlaneseq }
  0x93   :  { %350 = vadd.xlane.f32.xlu0 %v349_v9 }
  0x94   :  { %v443_v11 = vand.u32 127, %v442_v8  ;;  %v1984_v12 = vshrl.u32 %v442_v8, 7 }
  0x96   :  { %v448_v14 = vadd.s32 4294967288, %v443_v11  ;;  %v455_v15 = vadd.s32 4294967280, %v443_v11  ;;  %v462_v16 = vadd.s32 4294967272, %v443_v11  ;;  %v1991_v18 = vsub.s32 %v443_v11, %v1984_v12 }
  0x97   :  { %v469_v19 = vadd.s32 4294967264, %v443_v11  ;;  %v476_v20 = vadd.s32 4294967256, %v443_v11  ;;  %v483_v21 = vadd.s32 4294967248, %v443_v11  ;;  %v490_v23 = vadd.s32 4294967240, %v443_v11 }
  0x98   :  { %v497_v24 = vadd.s32 4294967232, %v443_v11  ;;  %v504_v27 = vadd.s32 4294967224, %v443_v11  ;;  %v511_v8 = vadd.s32 4294967216, %v443_v11  ;;  %v451_v54 = vsub.s32 %v448_v14, %v1984_v12 }
  0x99   :  { %v518_v41 = vadd.s32 4294967208, %v443_v11  ;;  %v525_v40 = vadd.s32 4294967200, %v443_v11  ;;  %v1997_v29 = vsub.s32 %v455_v15, %v1984_v12  ;;  %v2000_v28 = vsub.s32 %v462_v16, %v1984_v12 }
  0x9a   :  { %v2011_v14 = vsub.s32 %v483_v21, %v1984_v12  ;;  %v2016_v15 = vsub.s32 %v490_v23, %v1984_v12  ;;  %v2019_v16 = vsub.s32 %v497_v24, %v1984_v12 }
  0x9b   :  { %v2032_v21 = vsub.s32 %v525_v40, %v1984_v12 }
  0x9d   :  { %2323 = vst [vmem:[#allocation20_spill] sm:$0xff] %v2032_v21 }
  0xa3   :  { %v1898_v25 = vpop.xlane.xlu1 %212 }
  0xa4   :  { %v1900_v26 = vpop.xlane.xlu0 %164 }
  0xa7   :  { %v1902_v30 = vpop.xlane.xlu1 %215 }
  0xa8   :  { %v1904_v31 = vpop.xlane.xlu0 %167 }
  0xa9   :  { %v452_v23 = vrot.slane %v1904_v31, %v451_v54 }
  0xab   :  { %v1906_v32 = vpop.xlane.xlu1 %218 }
  0xac   :  { %v1908_v33 = vpop.xlane.xlu0 %170  ;;  %v565_v24 = vrot.slane %v1906_v32, %v1997_v29  ;;  %v447_v32 = vrot.slane %v1900_v26, %v1991_v18 }
  0xae   :  { %v454_v26 = vsel %vm453_vm1, %v452_v23, %v447_v32 }
  0xaf   :  { %v1910_v34 = vpop.xlane.xlu1 %263 }
  0xb0   :  { %v1912_v35 = vpop.xlane.xlu0 %260  ;;  %v639_v40 = vrot.slane %v1910_v34, %v451_v54 }
  0xb1   :  { %v635_v21 = vrot.slane %v1912_v35, %v1991_v18 }
  0xb3   :  { %v1914_v36 = vpop.xlane.xlu1 %221 }
  0xb4   :  { %v1916_v37 = vpop.xlane.xlu0 %173 }
  0xb7   :  { %v1918_v38 = vpop.xlane.xlu1 %308 }
  0xb8   :  { %v1920_v39 = vpop.xlane.xlu0 %266 }
  0xbb   :  { %v1922_v42 = vpop.xlane.xlu1 %176 }
  0xbc   :  { %v1924_v43 = vpop.xlane.xlu0 %311 }
  0xbf   :  { %v1926_v44 = vpop.xlane.xlu1 %269 }
  0xc0   :  { %v1928_v45 = vpop.xlane.xlu0 %224 }
  0xc3   :  { %v1930_v46 = vpop.xlane.xlu1 %179 }
  0xc4   :  { %v1932_v47 = vpop.xlane.xlu0 %314 }
  0xc7   :  { %v1934_v48 = vpop.xlane.xlu1 %272 }
  0xc8   :  { %v1936_v49 = vpop.xlane.xlu0 %227 }
  0xcb   :  { %v1938_v50 = vpop.xlane.xlu1 %182 }
  0xcc   :  { %v1940_v51 = vpop.xlane.xlu0 %317  ;;  %v487_v32 = vrot.slane %v1938_v50, %v2011_v14 }
  0xcf   :  { %v1942_v52 = vpop.xlane.xlu1 %275 }
  0xd0   :  { %v1944_v53 = vpop.xlane.xlu0 %230 }
  0xd3   :  { %v1946_v55 = vpop.xlane.xlu1 %185 }
  0xd4   :  { %v1948_v56 = vpop.xlane.xlu0 %320 }
  0xd7   :  { %v1950_v57 = vpop.xlane.xlu1 %278 }
  0xd8   :  { %v1952_v58 = vpop.xlane.xlu0 %233 }
  0xdb   :  { %v1954_v59 = vpop.xlane.xlu1 %188 }
  0xdc   :  { %v1956_v60 = vpop.xlane.xlu0 %323 }
  0xdf   :  { %v1958_v61 = vpop.xlane.xlu1 %281 }
  0xe0   :  { %v1960_v62 = vpop.xlane.xlu0 %236 }
  0xe3   :  { %v1962_v63 = vpop.xlane.xlu1 %191 }
  0xe4   :  { %v1964_v0 = vpop.xlane.xlu0 %326 }
  0xe7   :  { %v1966_v1 = vpop.xlane.xlu1 %284 }
  0xe8   :  { %v1968_v2 = vpop.xlane.xlu0 %239 }
  0xeb   :  { %v1970_v3 = vpop.xlane.xlu1 %194 }
  0xec   :  { %v1972_v4 = vpop.xlane.xlu0 %329 }
  0xef   :  { %v1974_v5 = vpop.xlane.xlu1 %287 }
  0xf0   :  { %v1976_v6 = vpop.xlane.xlu0 %242 }
  0xf3   :  { %v1978_v7 = vpop.xlane.xlu1 %197 }
  0xf4   :  { %2315 = vst [vmem:[#allocation12_spill] sm:$0xff] %v1978_v7  ;;  %v1980_v9 = vpop.xlane.xlu0 %332  ;;  %v539_v7 = vadd.s32 4294967184, %v443_v11 }
  0xf5   :  { %2316 = vst [vmem:[#allocation13_spill] sm:$0xff] %v1980_v9  ;;  %v2029_v9 = vsub.s32 %v518_v41, %v1984_v12  ;;  %v459_v41 = vrot.slane %v1908_v33, %v1997_v29  ;;  %v644_v33 = vrot.slane %v1920_v39, %v1997_v29 }
  0xf6   :  { %v2068_v39 = vsub.s32 %v539_v7, %v1984_v12 }
  0xf7   :  { %v1982_v10 = vpop.xlane.xlu1 %290 }
  0xf8   :  { %2317 = vst [vmem:[#allocation14_spill] sm:$0xff] %v1982_v10  ;;  %v1986_v13 = vpop.xlane.xlu0 %245 }
  0xf9   :  { %2318 = vst [vmem:[#allocation15_spill] sm:$0xff] %v1986_v13  ;;  %v2008_v13 = vsub.s32 %v476_v20, %v1984_v12  ;;  %v560_v20 = vrot.slane %v1902_v30, %v451_v54  ;;  %v556_v30 = vrot.slane %v1898_v25, %v1991_v18  ;;  %v466_v25 = vrot.slane %v1916_v37, %v2000_v28 }
  0xfb   :  { %v1988_v17 = vpop.xlane.xlu1 %200  ;;  %v561_v34 = vsel %vm453_vm1, %v560_v20, %v556_v30 }
  0xfc   :  { %2319 = vst [vmem:[#allocation16_spill] sm:$0xff] %v1988_v17  ;;  %v1993_v22 = vpop.xlane.xlu0 %335 }
  0xfd   :  { %2320 = vst [vmem:[#allocation17_spill] sm:$0xff] %v1993_v22  ;;  %v2005_v22 = vsub.s32 %v469_v19, %v1984_v12  ;;  %v2025_v19 = vsub.s32 %v511_v8, %v1984_v12  ;;  %v546_v8 = vadd.s32 4294967176, %v443_v11 }
  0xff   :  { %v2002_v17 = vpop.xlane.xlu1 %293  ;;  %v473_v35 = vrot.slane %v1922_v42, %v2005_v22  ;;  %v2071_v20 = vsub.s32 %v546_v8, %v1984_v12  ;;  %v461_v42 = vsel %vm460_vm2, %v459_v41, %v454_v26  ;;  %v575_v8 = vrot.slane %v1928_v45, %v2005_v22 }
 0x100   :  { %2321 = vst [vmem:[#allocation18_spill] sm:$0xff] %v2002_v17  ;;  %v2013_v10 = vpop.xlane.xlu0 %248  ;;  %v2022_v17 = vsub.s32 %v504_v27, %v1984_v12  ;;  %v468_v7 = vsel %vm467_vm3, %v466_v25, %v461_v42  ;;  %v728_v45 = vrot.slane %v1940_v51, %v2000_v28  ;;  %v664_v51 = vrot.slane %v1950_v57, %v2011_v14 }
 0x101   :  { %2322 = vst [vmem:[#allocation19_spill] sm:$0xff] %v2013_v10  ;;  %v532_v10 = vadd.s32 4294967192, %v443_v11  ;;  %v570_v11 = vrot.slane %v1914_v36, %v2000_v28  ;;  %v566_v36 = vsel %vm460_vm2, %v565_v24, %v561_v34  ;;  %v475_v41 = vsel %vm474_vm4, %v473_v35, %v468_v7 }
 0x102   :  { %v738_v25 = vrot.slane %v1956_v60, %v2008_v13  ;;  %v669_v60 = vrot.slane %v1958_v61, %v2016_v15  ;;  %v743_v61 = vrot.slane %v1964_v0, %v2011_v14  ;;  %v674_v7 = vrot.slane %v1966_v1, %v2019_v16  ;;  %v2326_v1 = vld [vmem:[#allocation12_spill] sm:$0xff] }
 0x103   :  { %v2037_v27 = vpop.xlane.xlu1 %203  ;;  %v571_v24 = vsel %vm467_vm3, %v570_v11, %v566_v36  ;;  %v605_v0 = vrot.slane %v1976_v6, %v2025_v19 }
 0x104   :  { %2324 = vst [vmem:[#allocation21_spill] sm:$0xff] %v2037_v27  ;;  %v2046_v31 = vpop.xlane.xlu0 %338  ;;  %v2061_v27 = vsub.s32 %v532_v10, %v1984_v12  ;;  %v649_v10 = vrot.slane %v1926_v44, %v2000_v28  ;;  %v723_v44 = vrot.slane %v1932_v47, %v1997_v29  ;;  %v659_v29 = vrot.slane %v1942_v52, %v2008_v13 }
 0x105   :  { %2325 = vst [vmem:[#allocation22_spill] sm:$0xff] %v2046_v31  ;;  %v718_v31 = vrot.slane %v1924_v43, %v451_v54  ;;  %v640_v54 = vsel %vm453_vm1, %v639_v40, %v635_v21  ;;  %v714_v43 = vrot.slane %v1918_v38, %v1991_v18  ;;  %v480_v38 = vrot.slane %v1930_v46, %v2008_v13 }
 0x106   :  { %v645_v30 = vsel %vm460_vm2, %v644_v33, %v640_v54  ;;  %v654_v18 = vrot.slane %v1934_v48, %v2005_v22  ;;  %v580_v40 = vrot.slane %v1936_v49, %v2008_v13  ;;  %v585_v47 = vrot.slane %v1944_v53, %v2011_v14 }
 0x107   :  { %v2065_v37 = vpop.xlane.xlu1 %296  ;;  %v719_v21 = vsel %vm453_vm1, %v718_v31, %v714_v43  ;;  %v650_v46 = vsel %vm467_vm3, %v649_v10, %v645_v30  ;;  %v494_v48 = vrot.slane %v1946_v55, %v2016_v15  ;;  %v576_v50 = vsel %vm474_vm4, %v575_v8, %v571_v24 }
 0x108   :  { %v2079_v23 = vpop.xlane.xlu0 %251  ;;  %v733_v28 = vrot.slane %v1948_v56, %v2005_v22  ;;  %v590_v52 = vrot.slane %v1952_v58, %v2016_v15  ;;  %v482_v53 = vsel %vm481_vm5, %v480_v38, %v475_v41  ;;  %v724_v11 = vsel %vm460_vm2, %v723_v44, %v719_v21  ;;  %v2327_v38 = vld [vmem:[#allocation13_spill] sm:$0xff] }
 0x109   :  { %v501_v55 = vrot.slane %v1954_v59, %v2019_v16  ;;  %v655_v33 = vsel %vm474_vm4, %v654_v18, %v650_v46  ;;  %v581_v56 = vsel %vm481_vm5, %v580_v40, %v576_v50  ;;  %v489_v57 = vsel %vm488_vm6, %v487_v32, %v482_v53  ;;  %v2329_v18 = vld [vmem:[#allocation15_spill] sm:$0xff]  ;;  %v2330_v32 = vld [vmem:[#allocation20_spill] sm:$0xff] }
 0x10a   :  { %v729_v22 = vsel %vm467_vm3, %v728_v45, %v724_v11  ;;  %v660_v34 = vsel %vm481_vm5, %v659_v29, %v655_v33  ;;  %v586_v35 = vsel %vm488_vm6, %v585_v47, %v581_v56  ;;  %v496_v59 = vsel %vm495_vm7, %v494_v48, %v489_v57  ;;  %v2331_v45 = vld [vmem:[#allocation16_spill] sm:$0xff]  ;;  %v2332_v29 = vld [vmem:[#allocation17_spill] sm:$0xff] }
 0x10b   :  { %v2100_v31 = vpop.xlane.xlu1 %206  ;;  %v734_v26 = vsel %vm474_vm4, %v733_v28, %v729_v22  ;;  %v665_v36 = vsel %vm488_vm6, %v664_v51, %v660_v34  ;;  %v591_v42 = vsel %vm495_vm7, %v590_v52, %v586_v35  ;;  %v595_v54 = vrot.slane %v1960_v62, %v2019_v16  ;;  %v2334_v22 = vld [vmem:[#allocation19_spill] sm:$0xff] }
 0x10c   :  { %v2109_v49 = vpop.xlane.xlu0 %341  ;;  %v503_v43 = vsel %vm502_vm8, %v501_v55, %v496_v59  ;;  %v739_v10 = vsel %vm481_vm5, %v738_v25, %v734_v26  ;;  %v508_v24 = vrot.slane %v1962_v63, %v2022_v17  ;;  %v600_v30 = vrot.slane %v1968_v2, %v2022_v17  ;;  %v2333_v55 = vld [vmem:[#allocation18_spill] sm:$0xff] }
 0x10d   :  { %v515_v8 = vrot.slane %v1970_v3, %v2025_v19  ;;  %v748_v62 = vrot.slane %v1972_v4, %v2016_v15  ;;  %v670_v21 = vsel %vm495_vm7, %v669_v60, %v665_v36  ;;  %v679_v63 = vrot.slane %v1974_v5, %v2022_v17  ;;  %v2328_v15 = vld [vmem:[#allocation14_spill] sm:$0xff]  ;;  %v2335_v36 = vld [vmem:[#allocation21_spill] sm:$0xff] }
 0x10e   :  { %v522_v14 = vrot.slane %v2326_v1, %v2029_v9  ;;  %v596_v3 = vsel %vm502_vm8, %v595_v54, %v591_v42  ;;  %v753_v4 = vrot.slane %v2327_v38, %v2019_v16  ;;  %v684_v44 = vrot.slane %v2328_v15, %v2025_v19  ;;  %v2336_v54 = vld [vmem:[#allocation22_spill] sm:$0xff] }
 0x10f   :  { %v2128_v58 = vpop.xlane.xlu1 %299  ;;  %v610_v40 = vrot.slane %v2329_v18, %v2029_v9  ;;  %v510_v5 = vsel %vm509_vm9, %v508_v24, %v503_v43  ;;  %v744_v6 = vsel %vm488_vm6, %v743_v61, %v739_v10  ;;  %v529_v46 = vrot.slane %v2331_v45, %v2330_v32 }
 0x110   :  { %v2135_v13 = vpop.xlane.xlu0 %254  ;;  %v758_v47 = vrot.slane %v2332_v29, %v2022_v17  ;;  %v675_v48 = vsel %vm502_vm8, %v674_v7, %v670_v21  ;;  %v601_v16 = vsel %vm509_vm9, %v600_v30, %v596_v3  ;;  %v517_v50 = vsel %vm516_vm10, %v515_v8, %v510_v5 }
 0x111   :  { %v749_v28 = vsel %vm495_vm7, %v748_v62, %v744_v6  ;;  %v680_v52 = vsel %vm509_vm9, %v679_v63, %v675_v48  ;;  %v606_v53 = vsel %vm516_vm10, %v605_v0, %v601_v16  ;;  %v524_v11 = vsel %vm523_vm11, %v522_v14, %v517_v50  ;;  %v871_v50 = vld [vmem:[%s2302_s3 + $0x10] sm:$0xff] }
 0x112   :  { %v689_v17 = vrot.slane %v2333_v55, %v2029_v9  ;;  %v754_v33 = vsel %vm502_vm8, %v753_v4, %v749_v28  ;;  %v685_v56 = vsel %vm516_vm10, %v684_v44, %v680_v52  ;;  %v611_v57 = vsel %vm523_vm11, %v610_v40, %v606_v53  ;;  %v872_v28 = vld [vmem:[%s2302_s3 + $0x18] sm:$0xff]  ;;  %v1497_v52 = vld [vmem:[%s2301_s2] ss:$0 sm:$0xff]  ;;  %s1783_s2 = smov [#allocation5]  }
 0x113   :  { %v2156_v41 = vpop.xlane.xlu1 %209  ;;  %v615_v34 = vrot.slane %v2334_v22, %v2330_v32  ;;  %vm792_vm1 = vcmask 1042434   ;;  %v531_v35 = vsel %vm530_vm12, %v529_v46, %v524_v11  ;;  %v759_v59 = vsel %vm509_vm9, %v758_v47, %v754_v33  ;;  %v869_v47 = vld [vmem:[%s2302_s3] sm:$0xff] }
 0x114   :  { %v345_v2 = vpop.xlane.xlu0 %344  ;;  %v694_v60 = vrot.slane %v2065_v37, %v2330_v32  ;;  %v620_v26 = vrot.slane %v2079_v23, %v2061_v27  ;;  %v536_v42 = vrot.slane %v2335_v36, %v2061_v27  ;;  %v763_v43 = vrot.slane %v2336_v54, %v2025_v19  ;;  %v1498_v33 = vld [vmem:[%s2303_s4] ss:$0 sm:$0xff] }
 0x115   :  { %v699_v10 = vrot.slane %v2128_v58, %v2061_v27  ;;  %v625_v24 = vrot.slane %v2135_v13, %v2068_v39  ;;  %v690_v7 = vsel %vm523_vm11, %v689_v17, %v685_v56  ;;  %v768_v37 = vrot.slane %v2109_v49, %v2029_v9 }
 0x116   :  { %v616_v62 = vsel %vm530_vm12, %v615_v34, %v611_v57  ;;  %v543_v19 = vrot.slane %v2100_v31, %v2068_v39  ;;  %v773_v58 = vrot.slane %v345_v2, %v2330_v32  ;;  %v695_v21 = vsel %vm530_vm12, %v694_v60, %v690_v7 }
 0x117   :  { %v303_v51 = vpop.xlane.xlu1 %302  ;;  %v621_v63 = vsel %vm537_vm13, %v620_v26, %v616_v62  ;;  %v550_v9 = vrot.slane %v2156_v41, %v2071_v20  ;;  %v538_v0 = vsel %vm537_vm13, %v536_v42, %v531_v35  ;;  %v764_v1 = vsel %vm516_vm10, %v763_v43, %v759_v59  ;;  %v1608_v62 = vld [vmem:[#allocation2 + $0x8] sm:$0xff] }
 0x118   :  { %v258_v25 = vpop.xlane.xlu0 %257  ;;  %v704_v23 = vrot.slane %v303_v51, %v2068_v39  ;;  %v700_v14 = vsel %vm537_vm13, %v699_v10, %v695_v21  ;;  %v626_v31 = vsel %vm544_vm14, %v625_v24, %v621_v63  ;;  %v769_v3 = vsel %vm523_vm11, %v768_v37, %v764_v1  ;;  %v1606_v37 = vld [vmem:[#allocation2 + $0x18] sm:$0xff]  ;;  %v1609_v21 = vld [vmem:[#allocation2 + $0x20] sm:$0xff] }
 0x119   :  { %v630_v30 = vrot.slane %v258_v25, %v2071_v20  ;;  %v774_v44 = vsel %vm530_vm12, %v773_v58, %v769_v3  ;;  %vm794_vm2 = vcmask 1043459   ;;  %v2337_v16 = vmov 0.0|0.0  }
 0x11a   :  { %v705_v38 = vsel %vm544_vm14, %v704_v23, %v700_v14  ;;  %v1596_v51 = vpack.c.bf16 %v872_v28, %v871_v50  ;;  %vm880_vm3 = vcmask 261120   ;;  %v958_v35 = vsub.s32 0, %v1984_v12  ;;  %v1612_v14 = vld [vmem:[#allocation2 + $0x48] sm:$0xff]  ;;  %v1621_v28 = vld [vmem:[#allocation2 + $0x70] sm:$0xff] }
 0x11b   :  { %v306_v61 = vpop.xlane.xlu1 %305  ;;  %v631_v4 = vsel %vm551_vm15, %v630_v30, %v626_v31  ;;  %v1025_v26 = vsub.s32 1, %v1984_v12  ;;  %v1092_v42 = vsub.s32 2, %v1984_v12  ;;  %v1159_v43 = vsub.s32 3, %v1984_v12  ;;  %v1607_v30 = vld [vmem:[#allocation2] sm:$0xff] }
 0x11c   :  { %v348_v8 = vpop.xlane.xlu0 %347  ;;  %v709_v13 = vrot.slane %v306_v61, %v2071_v20  ;;  %v1605_v61 = vld [vmem:[#allocation2 + $0x10] sm:$0xff] }
 0x11d   :  { %v778_v49 = vrot.slane %v348_v8, %v2061_v27  ;;  %v545_v27 = vsel %vm544_vm14, %v543_v19, %v538_v0  ;;  %v1611_v0 = vld [vmem:[#allocation2 + $0x40] sm:$0xff] }
 0x11e   :  { %v710_v18 = vsel %vm551_vm15, %v709_v13, %v705_v38  ;;  %v552_v5 = vsel %vm551_vm15, %v550_v9, %v545_v27  ;;  %v1610_v9 = vld [vmem:[#allocation2 + $0x28] sm:$0xff]  ;;  %v1613_v38 = vld [vmem:[#allocation2 + $0x30] sm:$0xff]  ;;  %v1615_v27 = vld [vmem:[#allocation2 + $0x60] sm:$0xff] }
 0x11f   :  { %v354_v2 = vpop.xlane.xlu1 %353  ;;  %v779_v6 = vsel %vm537_vm13, %v778_v49, %v774_v44  ;;  %v791_v45 = vsel %vm790_vm0, %v631_v4, %v552_v5 }
 0x120   :  { %v351_v15 = vpop.xlane.xlu0 %350  ;;  %v788_v41 = vrot.slane %v354_v2, %v2071_v20  ;;  %v793_v20 = vsel %vm792_vm1, %v710_v18, %v791_v45  ;;  %v1616_v18 = vld [vmem:[#allocation2 + $0x68] sm:$0xff] }
 0x121   :  { %v783_v40 = vrot.slane %v351_v15, %v2068_v39  ;;  %v870_v39 = vld [vmem:[%s2302_s3 + $0x8] sm:$0xff]  ;;  %v1614_v15 = vld [vmem:[#allocation2 + $0x38] sm:$0xff]  ;;  %s1485_s3 = sshll.u32 %s1783_s2, 4  ;;  %s1486_s3 = int_to_ptr.vmem [resolvable:$true] %s1485_s3 }
 0x122   :  { %v1593_v48 = vpack.c.bf16 %v870_v39, %v869_v47  ;;  %v1620_v39 = vld [vmem:[#allocation2 + $0x88] sm:$0xff]  ;;  %s1751_s4 = scalar_lea.vmem %s1486_s3, 16384  ;;  %p1756_p9 = scmp.lt.s32.totalorder %s1486_s3, %s1486_s3 }
 0x123   :  { %v784_v32 = vsel %vm544_vm14, %v783_v40, %v779_v6  ;;  %p1752_p8 = scmp.ne.s32.totalorder %s1486_s3, %s1751_s4  ;;  %p1757_p10 = scmp.lt.s32.totalorder %s1751_s4, %s1751_s4 }
 0x124   :  { %v789_v46 = vsel %vm551_vm15, %v788_v41, %v784_v32  ;;  %1594 = vmatpush3.bf16.msra.mxu1 %v1593_v48  ;;  %v1617_v32 = vld [vmem:[#allocation2 + $0x50] sm:$0xff] }
 0x125   :  { %v795_v29 = vsel %vm794_vm2, %v789_v46, %v793_v20  ;;  %1595 = vmatprep.subr.bf16.mxu1 %v2337_v16  ;;  %v1618_v46 = vld [vmem:[#allocation2 + $0x58] sm:$0xff]  ;;  %p1758_p11 = por %p1757_p10, %p1756_p9 }
 0x126   :  { %1555 = vmatmul.mubr.f32.vlgmr.msra.gmra.mrb[0].mxu0 %v795_v29  ;;  %v1619_v29 = vld [vmem:[#allocation2 + $0x80] sm:$0xff] }
 0x127   :  { %p1759_p12 = pnand %p1758_p11, %p1752_p8 }
 0x128   :  { %1597 = vmatpush3.bf16.msra.mxu1 %v1596_v51 }
 0x1f9   :  { %v863_v53 = vpop.f32.mrb[0].mxu0 }
 0x1fa   :  { %v864_v11 = vadd.f32 %v1497_v52, %v863_v53  ;;  %v1556_v55 = vpop.f32.mrb[1].mxu0  ;;  %v1622_v52 = vld [vmem:[#allocation2 + $0x78] sm:$0xff] }
 0x1fc   :  { %v867_v17 = vmax.f32 %v864_v11, 0.0  ;;  %v1623_v11 = vld [vmem:[#allocation2 + $0xa0] sm:$0xff] }
 0x1fe   :  { %v868_v25 = vmin.f32 %v867_v17, 6.0  ;;  %v1624_v17 = vld [vmem:[#allocation2 + $0xa8] sm:$0xff] }
 0x200   :  { %1566 = vmatmul.mubr.msk.f32.vlgmr.msra.gmra.mrb[0].mxu1 %vm880_vm3, %v868_v25 }
 0x2d3   :  { %v950_v56 = vpop.f32.mrb[0].mxu1 }
 0x2d4   :  { %v951_v57 = vadd.f32 %v1498_v33, %v950_v56  ;;  %v1567_v22 = vpop.f32.mrb[1].mxu1 }
 0x2d6   :  { %v954_v34 = vmax.f32 %v951_v57, 0.0  ;;  %v1625_v57 = vld [vmem:[#allocation2 + $0x90] sm:$0xff] }
 0x2d8   :  { %v955_v59 = vmin.f32 %v954_v34, 6.0  ;;  %v1626_v34 = vld [vmem:[#allocation2 + $0x98] sm:$0xff] }
 0x2da   :  { %v959_v60 = vrot.slane %v955_v59, %v958_v35  ;;  %v1026_v36 = vrot.slane %v955_v59, %v1025_v26  ;;  %v1093_v54 = vrot.slane %v955_v59, %v1092_v42  ;;  %v2262_v10 = vrot.slane %v955_v59, %v1159_v43  ;;  %v1627_v59 = vld [vmem:[#allocation2 + $0xc0] sm:$0xff]  ;;  %v1628_v26 = vld [vmem:[#allocation2 + $0xc8] sm:$0xff]  ;;  %v1629_v43 = vld [vmem:[#allocation2 + $0xb0] sm:$0xff] }
 0x2dc   :  { %965 = vbcast.lane.b32.xlu1 %v959_v60, 264  ;;  %961 = vbcast.lane.b32.xlu0 %v959_v60, 256 }
 0x2e0   :  { %969 = vbcast.lane.b32.xlu1 %v959_v60, 272  ;;  %977 = vbcast.lane.b32.xlu0 %v959_v60, 288 }
 0x2e4   :  { %973 = vbcast.lane.b32.xlu1 %v959_v60, 280  ;;  %985 = vbcast.lane.b32.xlu0 %v959_v60, 304 }
 0x2e8   :  { %981 = vbcast.lane.b32.xlu1 %v959_v60, 296  ;;  %993 = vbcast.lane.b32.xlu0 %v959_v60, 320 }
 0x2ec   :  { %989 = vbcast.lane.b32.xlu1 %v959_v60, 312  ;;  %1001 = vbcast.lane.b32.xlu0 %v959_v60, 336 }
 0x2f0   :  { %997 = vbcast.lane.b32.xlu1 %v959_v60, 328  ;;  %1009 = vbcast.lane.b32.xlu0 %v959_v60, 352 }
 0x2f4   :  { %1005 = vbcast.lane.b32.xlu1 %v959_v60, 344  ;;  %1017 = vbcast.lane.b32.xlu0 %v959_v60, 368 }
 0x2f8   :  { %1013 = vbcast.lane.b32.xlu1 %v959_v60, 360  ;;  %1028 = vbcast.lane.b32.xlu0 %v1026_v36, 256 }
 0x2fc   :  { %1021 = vbcast.lane.b32.xlu1 %v959_v60, 376  ;;  %1036 = vbcast.lane.b32.xlu0 %v1026_v36, 272 }
 0x300   :  { %1032 = vbcast.lane.b32.xlu1 %v1026_v36, 264  ;;  %1044 = vbcast.lane.b32.xlu0 %v1026_v36, 288 }
 0x304   :  { %1040 = vbcast.lane.b32.xlu1 %v1026_v36, 280  ;;  %1052 = vbcast.lane.b32.xlu0 %v1026_v36, 304 }
 0x308   :  { %1048 = vbcast.lane.b32.xlu1 %v1026_v36, 296  ;;  %1060 = vbcast.lane.b32.xlu0 %v1026_v36, 320 }
 0x30c   :  { %1056 = vbcast.lane.b32.xlu1 %v1026_v36, 312  ;;  %1068 = vbcast.lane.b32.xlu0 %v1026_v36, 336 }
 0x310   :  { %1064 = vbcast.lane.b32.xlu1 %v1026_v36, 328  ;;  %1076 = vbcast.lane.b32.xlu0 %v1026_v36, 352 }
 0x314   :  { %1072 = vbcast.lane.b32.xlu1 %v1026_v36, 344  ;;  %1084 = vbcast.lane.b32.xlu0 %v1026_v36, 368 }
 0x318   :  { %1080 = vbcast.lane.b32.xlu1 %v1026_v36, 360  ;;  %1095 = vbcast.lane.b32.xlu0 %v1093_v54, 256 }
 0x31c   :  { %1088 = vbcast.lane.b32.xlu1 %v1026_v36, 376  ;;  %1103 = vbcast.lane.b32.xlu0 %v1093_v54, 272 }
 0x320   :  { %1099 = vbcast.lane.b32.xlu1 %v1093_v54, 264  ;;  %1111 = vbcast.lane.b32.xlu0 %v1093_v54, 288 }
 0x324   :  { %1107 = vbcast.lane.b32.xlu1 %v1093_v54, 280  ;;  %1119 = vbcast.lane.b32.xlu0 %v1093_v54, 304 }
 0x328   :  { %1115 = vbcast.lane.b32.xlu1 %v1093_v54, 296  ;;  %1127 = vbcast.lane.b32.xlu0 %v1093_v54, 320 }
 0x32c   :  { %1123 = vbcast.lane.b32.xlu1 %v1093_v54, 312  ;;  %1135 = vbcast.lane.b32.xlu0 %v1093_v54, 336 }
 0x330   :  { %1131 = vbcast.lane.b32.xlu1 %v1093_v54, 328  ;;  %1143 = vbcast.lane.b32.xlu0 %v1093_v54, 352 }
 0x334   :  { %1139 = vbcast.lane.b32.xlu1 %v1093_v54, 344  ;;  %1151 = vbcast.lane.b32.xlu0 %v1093_v54, 368 }
 0x338   :  { %1147 = vbcast.lane.b32.xlu1 %v1093_v54, 360  ;;  %1162 = vbcast.lane.b32.xlu0 %v2262_v10, 256 }
 0x33c   :  { %1155 = vbcast.lane.b32.xlu1 %v1093_v54, 376  ;;  %1170 = vbcast.lane.b32.xlu0 %v2262_v10, 272 }
 0x340   :  { %1166 = vbcast.lane.b32.xlu1 %v2262_v10, 264  ;;  %1178 = vbcast.lane.b32.xlu0 %v2262_v10, 288 }
 0x344   :  { %1174 = vbcast.lane.b32.xlu1 %v2262_v10, 280  ;;  %1186 = vbcast.lane.b32.xlu0 %v2262_v10, 304 }
 0x348   :  { %1182 = vbcast.lane.b32.xlu1 %v2262_v10, 296  ;;  %1194 = vbcast.lane.b32.xlu0 %v2262_v10, 320 }
 0x34c   :  { %1190 = vbcast.lane.b32.xlu1 %v2262_v10, 312  ;;  %1202 = vbcast.lane.b32.xlu0 %v2262_v10, 336 }
 0x34e   :  { %v966_v12 = vpop.permute.xlu1 %965  ;;  %v962_v24 = vpop.permute.xlu0 %961 }
 0x34f   :  { %v1226_v7 = vmul.f32 %v1605_v61, %v966_v12  ;;  %v1227_v23 = vmul.f32 %v1606_v37, %v966_v12  ;;  %v1224_v8 = vmul.f32 %v1607_v30, %v962_v24  ;;  %v1225_v19 = vmul.f32 %v1608_v62, %v962_v24  ;;  %v1630_v12 = vld [vmem:[#allocation2 + $0xb8] sm:$0xff]  ;;  %v2338_v61 = vld [vmem:[#allocation8_spill] sm:$0xff]  ;;  %v2339_v37 = vld [vmem:[#allocation9_spill] sm:$0xff] }
 0x350   :  { %1198 = vbcast.lane.b32.xlu1 %v2262_v10, 328  ;;  %1210 = vbcast.lane.b32.xlu0 %v2262_v10, 352  ;;  %v1631_v62 = vld [vmem:[#allocation2 + $0xd0] sm:$0xff] }
 0x351   :  { %1354 = vst [vmem:[#allocation5 + $0x10] sm:$0xff] %v1226_v7  ;;  %1355 = vst [vmem:[#allocation5 + $0x18] sm:$0xff] %v1227_v23 }
 0x352   :  { %1352 = vst [vmem:[#allocation5] sm:$0xff] %v1224_v8  ;;  %1353 = vst [vmem:[#allocation5 + $0x8] sm:$0xff] %v1225_v19  ;;  %v970_v58 = vpop.permute.xlu1 %969  ;;  %v978_v13 = vpop.permute.xlu0 %977 }
 0x353   :  { %v1228_v63 = vmul.f32 %v1609_v21, %v970_v58  ;;  %v1229_v49 = vmul.f32 %v1610_v9, %v970_v58  ;;  %v1232_v1 = vmul.f32 %v1611_v0, %v978_v13  ;;  %v1233_v31 = vmul.f32 %v1612_v14, %v978_v13  ;;  %v1632_v58 = vld [vmem:[#allocation2 + $0xd8] sm:$0xff]  ;;  %v1633_v21 = vld [vmem:[#allocation2 + $0x100] sm:$0xff]  ;;  %v1634_v9 = vld [vmem:[#allocation2 + $0x108] sm:$0xff] }
 0x354   :  { %1206 = vbcast.lane.b32.xlu1 %v2262_v10, 344  ;;  %1218 = vbcast.lane.b32.xlu0 %v2262_v10, 368  ;;  %v2340_v14 = vld [vmem:[#allocation10_spill] sm:$0xff] }
 0x355   :  { %1356 = vst [vmem:[#allocation5 + $0x20] sm:$0xff] %v1228_v63  ;;  %1357 = vst [vmem:[#allocation5 + $0x28] sm:$0xff] %v1229_v49 }
 0x356   :  { %1360 = vst [vmem:[#allocation5 + $0x40] sm:$0xff] %v1232_v1  ;;  %1361 = vst [vmem:[#allocation5 + $0x48] sm:$0xff] %v1233_v31  ;;  %v974_v2 = vpop.permute.xlu1 %973  ;;  %v986_v3 = vpop.permute.xlu0 %985 }
 0x357   :  { %v1230_v4 = vmul.f32 %v1613_v38, %v974_v2  ;;  %v1231_v41 = vmul.f32 %v1614_v15, %v974_v2  ;;  %v1236_v44 = vmul.f32 %v1615_v27, %v986_v3  ;;  %v1237_v40 = vmul.f32 %v1616_v18, %v986_v3  ;;  %v2341_v2 = vld [vmem:[#allocation11_spill] sm:$0xff]  ;;  %v1635_v38 = vld [vmem:[#allocation2 + $0x120] sm:$0xff]  ;;  %v1636_v15 = vld [vmem:[#allocation2 + $0x128] sm:$0xff] }
 0x358   :  { %1214 = vbcast.lane.b32.xlu1 %v2262_v10, 360  ;;  %v1637_v18 = vld [vmem:[#allocation2 + $0x110] sm:$0xff] }
 0x359   :  { %1358 = vst [vmem:[#allocation5 + $0x30] sm:$0xff] %v1230_v4  ;;  %1359 = vst [vmem:[#allocation5 + $0x38] sm:$0xff] %v1231_v41 }
 0x35a   :  { %1364 = vst [vmem:[#allocation5 + $0x60] sm:$0xff] %v1236_v44  ;;  %1365 = vst [vmem:[#allocation5 + $0x68] sm:$0xff] %v1237_v40  ;;  %v982_v5 = vpop.permute.xlu1 %981  ;;  %v994_v6 = vpop.permute.xlu0 %993 }
 0x35b   :  { %v1234_v45 = vmul.f32 %v1617_v32, %v982_v5  ;;  %v1235_v20 = vmul.f32 %v1618_v46, %v982_v5  ;;  %v1240_v47 = vmul.f32 %v1619_v29, %v994_v6  ;;  %v1241_v48 = vmul.f32 %v1620_v39, %v994_v6  ;;  %v1638_v5 = vld [vmem:[#allocation2 + $0x118] sm:$0xff]  ;;  %v1639_v32 = vld [vmem:[#allocation2 + $0x140] sm:$0xff]  ;;  %v1640_v46 = vld [vmem:[#allocation2 + $0x148] sm:$0xff] }
 0x35c   :  { %1222 = vbcast.lane.b32.xlu1 %v2262_v10, 376  ;;  %v1641_v39 = vld [vmem:[#allocation2 + $0x130] sm:$0xff] }
 0x35d   :  { %1362 = vst [vmem:[#allocation5 + $0x50] sm:$0xff] %v1234_v45  ;;  %1363 = vst [vmem:[#allocation5 + $0x58] sm:$0xff] %v1235_v20 }
 0x35e   :  { %1368 = vst [vmem:[#allocation5 + $0x80] sm:$0xff] %v1240_v47  ;;  %1369 = vst [vmem:[#allocation5 + $0x88] sm:$0xff] %v1241_v48  ;;  %v990_v16 = vpop.permute.xlu1 %989  ;;  %v1002_v50 = vpop.permute.xlu0 %1001 }
 0x35f   :  { %v1238_v51 = vmul.f32 %v1621_v28, %v990_v16  ;;  %v1239_v53 = vmul.f32 %v1622_v52, %v990_v16  ;;  %v1244_v55 = vmul.f32 %v1623_v11, %v1002_v50  ;;  %v1245_v25 = vmul.f32 %v1624_v17, %v1002_v50  ;;  %v1642_v16 = vld [vmem:[#allocation2 + $0x138] sm:$0xff]  ;;  %v1643_v28 = vld [vmem:[#allocation2 + $0x160] sm:$0xff]  ;;  %v1644_v52 = vld [vmem:[#allocation2 + $0x168] sm:$0xff] }
 0x360   :  { %v1645_v17 = vld [vmem:[#allocation2 + $0x150] sm:$0xff] }
 0x361   :  { %1366 = vst [vmem:[#allocation5 + $0x70] sm:$0xff] %v1238_v51  ;;  %1367 = vst [vmem:[#allocation5 + $0x78] sm:$0xff] %v1239_v53 }
 0x362   :  { %1372 = vst [vmem:[#allocation5 + $0xa0] sm:$0xff] %v1244_v55  ;;  %1373 = vst [vmem:[#allocation5 + $0xa8] sm:$0xff] %v1245_v25  ;;  %v998_v33 = vpop.permute.xlu1 %997  ;;  %v1010_v56 = vpop.permute.xlu0 %1009 }
 0x363   :  { %v1242_v22 = vmul.f32 %v1625_v57, %v998_v33  ;;  %v1243_v35 = vmul.f32 %v1626_v34, %v998_v33  ;;  %v1248_v60 = vmul.f32 %v1627_v59, %v1010_v56  ;;  %v1249_v36 = vmul.f32 %v1628_v26, %v1010_v56  ;;  %v1646_v33 = vld [vmem:[#allocation2 + $0x158] sm:$0xff]  ;;  %v1647_v57 = vld [vmem:[#allocation2 + $0x180] sm:$0xff]  ;;  %v1648_v34 = vld [vmem:[#allocation2 + $0x188] sm:$0xff] }
 0x364   :  { %v1649_v26 = vld [vmem:[#allocation2 + $0x170] sm:$0xff] }
 0x365   :  { %1370 = vst [vmem:[#allocation5 + $0x90] sm:$0xff] %v1242_v22  ;;  %1371 = vst [vmem:[#allocation5 + $0x98] sm:$0xff] %v1243_v35 }
 0x366   :  { %1376 = vst [vmem:[#allocation5 + $0xc0] sm:$0xff] %v1248_v60  ;;  %1377 = vst [vmem:[#allocation5 + $0xc8] sm:$0xff] %v1249_v36  ;;  %v1006_v42 = vpop.permute.xlu1 %1005  ;;  %v1018_v54 = vpop.permute.xlu0 %1017 }
 0x367   :  { %v1246_v10 = vmul.f32 %v1629_v43, %v1006_v42  ;;  %v1247_v24 = vmul.f32 %v1630_v12, %v1006_v42  ;;  %v1252_v7 = vmul.f32 %v1018_v54, %v2338_v61  ;;  %v1253_v23 = vmul.f32 %v1018_v54, %v2339_v37  ;;  %v1650_v42 = vld [vmem:[#allocation2 + $0x178] sm:$0xff]  ;;  %v1651_v43 = vld [vmem:[#allocation2 + $0x1a0] sm:$0xff]  ;;  %v1652_v12 = vld [vmem:[#allocation2 + $0x1a8] sm:$0xff] }
 0x368   :  { %v1653_v37 = vld [vmem:[#allocation2 + $0x190] sm:$0xff] }
 0x369   :  { %1374 = vst [vmem:[#allocation5 + $0xb0] sm:$0xff] %v1246_v10  ;;  %1375 = vst [vmem:[#allocation5 + $0xb8] sm:$0xff] %v1247_v24 }
 0x36a   :  { %1380 = vst [vmem:[#allocation5 + $0xe0] sm:$0xff] %v1252_v7  ;;  %1381 = vst [vmem:[#allocation5 + $0xe8] sm:$0xff] %v1253_v23  ;;  %v1014_v30 = vpop.permute.xlu1 %1013  ;;  %v1029_v8 = vpop.permute.xlu0 %1028 }
 0x36b   :  { %v1250_v19 = vmul.f32 %v1631_v62, %v1014_v30  ;;  %v1251_v13 = vmul.f32 %v1632_v58, %v1014_v30  ;;  %v1256_v63 = vmul.f32 %v1633_v21, %v1029_v8  ;;  %v1257_v49 = vmul.f32 %v1634_v9, %v1029_v8  ;;  %v1654_v30 = vld [vmem:[#allocation2 + $0x198] sm:$0xff]  ;;  %v1655_v62 = vld [vmem:[#allocation2 + $0x1c0] sm:$0xff]  ;;  %v1656_v58 = vld [vmem:[#allocation2 + $0x1c8] sm:$0xff] }
 0x36c   :  { %v1657_v9 = vld [vmem:[#allocation2 + $0x1b0] sm:$0xff] }
 0x36d   :  { %1378 = vst [vmem:[#allocation5 + $0xd0] sm:$0xff] %v1250_v19  ;;  %1379 = vst [vmem:[#allocation5 + $0xd8] sm:$0xff] %v1251_v13 }
 0x36e   :  { %1384 = vst [vmem:[#allocation5 + $0x100] sm:$0xff] %v1256_v63  ;;  %1385 = vst [vmem:[#allocation5 + $0x108] sm:$0xff] %v1257_v49  ;;  %v1022_v0 = vpop.permute.xlu1 %1021  ;;  %v1037_v1 = vpop.permute.xlu0 %1036 }
 0x36f   :  { %v1254_v31 = vmul.f32 %v1022_v0, %v2340_v14  ;;  %v1255_v3 = vmul.f32 %v1022_v0, %v2341_v2  ;;  %v1260_v4 = vmul.f32 %v1635_v38, %v1037_v1  ;;  %v1261_v41 = vmul.f32 %v1636_v15, %v1037_v1  ;;  %v1658_v0 = vld [vmem:[#allocation2 + $0x1b8] sm:$0xff]  ;;  %v1659_v14 = vld [vmem:[#allocation2 + $0x1e0] sm:$0xff]  ;;  %v1660_v2 = vld [vmem:[#allocation2 + $0x1e8] sm:$0xff] }
 0x370   :  { %v1661_v15 = vld [vmem:[#allocation2 + $0x1d0] sm:$0xff] }
 0x371   :  { %1382 = vst [vmem:[#allocation5 + $0xf0] sm:$0xff] %v1254_v31  ;;  %1383 = vst [vmem:[#allocation5 + $0xf8] sm:$0xff] %v1255_v3 }
 0x372   :  { %1388 = vst [vmem:[#allocation5 + $0x120] sm:$0xff] %v1260_v4  ;;  %1389 = vst [vmem:[#allocation5 + $0x128] sm:$0xff] %v1261_v41  ;;  %v1033_v27 = vpop.permute.xlu1 %1032  ;;  %v1045_v44 = vpop.permute.xlu0 %1044 }
 0x373   :  { %v1258_v40 = vmul.f32 %v1637_v18, %v1033_v27  ;;  %v1259_v6 = vmul.f32 %v1638_v5, %v1033_v27  ;;  %v1264_v45 = vmul.f32 %v1639_v32, %v1045_v44  ;;  %v1265_v20 = vmul.f32 %v1640_v46, %v1045_v44  ;;  %v1662_v27 = vld [vmem:[#allocation2 + $0x1d8] sm:$0xff]  ;;  %v1663_v18 = vld [vmem:[#allocation2 + $0x200] sm:$0xff]  ;;  %v1664_v5 = vld [vmem:[#allocation2 + $0x208] sm:$0xff] }
 0x374   :  { %v1665_v46 = vld [vmem:[#allocation2 + $0x1f0] sm:$0xff] }
 0x375   :  { %1386 = vst [vmem:[#allocation5 + $0x110] sm:$0xff] %v1258_v40  ;;  %1387 = vst [vmem:[#allocation5 + $0x118] sm:$0xff] %v1259_v6 }
 0x376   :  { %1392 = vst [vmem:[#allocation5 + $0x140] sm:$0xff] %v1264_v45  ;;  %1393 = vst [vmem:[#allocation5 + $0x148] sm:$0xff] %v1265_v20  ;;  %v1041_v29 = vpop.permute.xlu1 %1040  ;;  %v1053_v47 = vpop.permute.xlu0 %1052 }
 0x377   :  { %v1262_v48 = vmul.f32 %v1641_v39, %v1041_v29  ;;  %v1263_v50 = vmul.f32 %v1642_v16, %v1041_v29  ;;  %v1268_v51 = vmul.f32 %v1643_v28, %v1053_v47  ;;  %v1269_v53 = vmul.f32 %v1644_v52, %v1053_v47  ;;  %v1666_v29 = vld [vmem:[#allocation2 + $0x1f8] sm:$0xff]  ;;  %v1667_v39 = vld [vmem:[#allocation2 + $0x220] sm:$0xff]  ;;  %v1668_v16 = vld [vmem:[#allocation2 + $0x228] sm:$0xff] }
 0x378   :  { %v1669_v52 = vld [vmem:[#allocation2 + $0x210] sm:$0xff] }
 0x379   :  { %1390 = vst [vmem:[#allocation5 + $0x130] sm:$0xff] %v1262_v48  ;;  %1391 = vst [vmem:[#allocation5 + $0x138] sm:$0xff] %v1263_v50 }
 0x37a   :  { %1396 = vst [vmem:[#allocation5 + $0x160] sm:$0xff] %v1268_v51  ;;  %1397 = vst [vmem:[#allocation5 + $0x168] sm:$0xff] %v1269_v53  ;;  %v1049_v11 = vpop.permute.xlu1 %1048  ;;  %v1061_v55 = vpop.permute.xlu0 %1060 }
 0x37b   :  { %v1266_v25 = vmul.f32 %v1645_v17, %v1049_v11  ;;  %v1267_v56 = vmul.f32 %v1646_v33, %v1049_v11  ;;  %v1272_v22 = vmul.f32 %v1647_v57, %v1061_v55  ;;  %v1273_v35 = vmul.f32 %v1648_v34, %v1061_v55  ;;  %v1670_v11 = vld [vmem:[#allocation2 + $0x218] sm:$0xff]  ;;  %v1671_v17 = vld [vmem:[#allocation2 + $0x240] sm:$0xff]  ;;  %v1672_v33 = vld [vmem:[#allocation2 + $0x248] sm:$0xff] }
 0x37c   :  { %v1673_v34 = vld [vmem:[#allocation2 + $0x230] sm:$0xff] }
 0x37d   :  { %1394 = vst [vmem:[#allocation5 + $0x150] sm:$0xff] %v1266_v25  ;;  %1395 = vst [vmem:[#allocation5 + $0x158] sm:$0xff] %v1267_v56 }
 0x37e   :  { %1400 = vst [vmem:[#allocation5 + $0x180] sm:$0xff] %v1272_v22  ;;  %1401 = vst [vmem:[#allocation5 + $0x188] sm:$0xff] %v1273_v35  ;;  %v1057_v59 = vpop.permute.xlu1 %1056  ;;  %v1069_v60 = vpop.permute.xlu0 %1068 }
 0x37f   :  { %v1270_v36 = vmul.f32 %v1649_v26, %v1057_v59  ;;  %v1271_v54 = vmul.f32 %v1650_v42, %v1057_v59  ;;  %v1276_v10 = vmul.f32 %v1651_v43, %v1069_v60  ;;  %v1277_v24 = vmul.f32 %v1652_v12, %v1069_v60  ;;  %v1674_v59 = vld [vmem:[#allocation2 + $0x238] sm:$0xff]  ;;  %v1675_v26 = vld [vmem:[#allocation2 + $0x260] sm:$0xff]  ;;  %v1676_v42 = vld [vmem:[#allocation2 + $0x268] sm:$0xff] }
 0x380   :  { %v1677_v12 = vld [vmem:[#allocation2 + $0x250] sm:$0xff] }
 0x381   :  { %1398 = vst [vmem:[#allocation5 + $0x170] sm:$0xff] %v1270_v36  ;;  %1399 = vst [vmem:[#allocation5 + $0x178] sm:$0xff] %v1271_v54 }
 0x382   :  { %1404 = vst [vmem:[#allocation5 + $0x1a0] sm:$0xff] %v1276_v10  ;;  %1405 = vst [vmem:[#allocation5 + $0x1a8] sm:$0xff] %v1277_v24  ;;  %v1065_v61 = vpop.permute.xlu1 %1064  ;;  %v1077_v7 = vpop.permute.xlu0 %1076 }
 0x383   :  { %v1274_v23 = vmul.f32 %v1653_v37, %v1065_v61  ;;  %v1275_v8 = vmul.f32 %v1654_v30, %v1065_v61  ;;  %v1280_v19 = vmul.f32 %v1655_v62, %v1077_v7  ;;  %v1281_v13 = vmul.f32 %v1656_v58, %v1077_v7  ;;  %v1678_v61 = vld [vmem:[#allocation2 + $0x258] sm:$0xff]  ;;  %v1679_v37 = vld [vmem:[#allocation2 + $0x280] sm:$0xff]  ;;  %v1680_v30 = vld [vmem:[#allocation2 + $0x288] sm:$0xff] }
 0x384   :  { %v1681_v58 = vld [vmem:[#allocation2 + $0x270] sm:$0xff] }
 0x385   :  { %1402 = vst [vmem:[#allocation5 + $0x190] sm:$0xff] %v1274_v23  ;;  %1403 = vst [vmem:[#allocation5 + $0x198] sm:$0xff] %v1275_v8 }
 0x386   :  { %1408 = vst [vmem:[#allocation5 + $0x1c0] sm:$0xff] %v1280_v19  ;;  %1409 = vst [vmem:[#allocation5 + $0x1c8] sm:$0xff] %v1281_v13  ;;  %v1073_v21 = vpop.permute.xlu1 %1072  ;;  %v1085_v63 = vpop.permute.xlu0 %1084 }
 0x387   :  { %v1278_v49 = vmul.f32 %v1657_v9, %v1073_v21  ;;  %v1279_v1 = vmul.f32 %v1658_v0, %v1073_v21  ;;  %v1284_v31 = vmul.f32 %v1659_v14, %v1085_v63  ;;  %v1285_v3 = vmul.f32 %v1660_v2, %v1085_v63  ;;  %v1682_v21 = vld [vmem:[#allocation2 + $0x278] sm:$0xff]  ;;  %v1683_v9 = vld [vmem:[#allocation2 + $0x2a0] sm:$0xff]  ;;  %v1684_v0 = vld [vmem:[#allocation2 + $0x2a8] sm:$0xff] }
 0x388   :  { %v1685_v2 = vld [vmem:[#allocation2 + $0x290] sm:$0xff] }
 0x389   :  { %1406 = vst [vmem:[#allocation5 + $0x1b0] sm:$0xff] %v1278_v49  ;;  %1407 = vst [vmem:[#allocation5 + $0x1b8] sm:$0xff] %v1279_v1 }
 0x38a   :  { %1412 = vst [vmem:[#allocation5 + $0x1e0] sm:$0xff] %v1284_v31  ;;  %1413 = vst [vmem:[#allocation5 + $0x1e8] sm:$0xff] %v1285_v3  ;;  %v1081_v38 = vpop.permute.xlu1 %1080  ;;  %v1096_v4 = vpop.permute.xlu0 %1095 }
 0x38b   :  { %v1282_v41 = vmul.f32 %v1661_v15, %v1081_v38  ;;  %v1283_v44 = vmul.f32 %v1662_v27, %v1081_v38  ;;  %v1288_v40 = vmul.f32 %v1663_v18, %v1096_v4  ;;  %v1289_v6 = vmul.f32 %v1664_v5, %v1096_v4  ;;  %v1686_v38 = vld [vmem:[#allocation2 + $0x298] sm:$0xff]  ;;  %v1687_v15 = vld [vmem:[#allocation2 + $0x2c0] sm:$0xff]  ;;  %v1688_v27 = vld [vmem:[#allocation2 + $0x2c8] sm:$0xff] }
 0x38c   :  { %v1689_v5 = vld [vmem:[#allocation2 + $0x2b0] sm:$0xff] }
 0x38d   :  { %1410 = vst [vmem:[#allocation5 + $0x1d0] sm:$0xff] %v1282_v41  ;;  %1411 = vst [vmem:[#allocation5 + $0x1d8] sm:$0xff] %v1283_v44 }
 0x38e   :  { %1416 = vst [vmem:[#allocation5 + $0x200] sm:$0xff] %v1288_v40  ;;  %1417 = vst [vmem:[#allocation5 + $0x208] sm:$0xff] %v1289_v6  ;;  %v1089_v32 = vpop.permute.xlu1 %1088  ;;  %v1104_v45 = vpop.permute.xlu0 %1103 }
 0x38f   :  { %v1286_v20 = vmul.f32 %v1665_v46, %v1089_v32  ;;  %v1287_v47 = vmul.f32 %v1666_v29, %v1089_v32  ;;  %v1292_v48 = vmul.f32 %v1667_v39, %v1104_v45  ;;  %v1293_v50 = vmul.f32 %v1668_v16, %v1104_v45  ;;  %v1690_v32 = vld [vmem:[#allocation2 + $0x2b8] sm:$0xff]  ;;  %v1691_v46 = vld [vmem:[#allocation2 + $0x2e0] sm:$0xff]  ;;  %v1692_v29 = vld [vmem:[#allocation2 + $0x2e8] sm:$0xff] }
 0x390   :  { %v1693_v16 = vld [vmem:[#allocation2 + $0x2d0] sm:$0xff] }
 0x391   :  { %1414 = vst [vmem:[#allocation5 + $0x1f0] sm:$0xff] %v1286_v20  ;;  %1415 = vst [vmem:[#allocation5 + $0x1f8] sm:$0xff] %v1287_v47 }
 0x392   :  { %1420 = vst [vmem:[#allocation5 + $0x220] sm:$0xff] %v1292_v48  ;;  %1421 = vst [vmem:[#allocation5 + $0x228] sm:$0xff] %v1293_v50  ;;  %v1100_v28 = vpop.permute.xlu1 %1099  ;;  %v1112_v51 = vpop.permute.xlu0 %1111 }
 0x393   :  { %v1290_v53 = vmul.f32 %v1669_v52, %v1100_v28  ;;  %v1291_v55 = vmul.f32 %v1670_v11, %v1100_v28  ;;  %v1296_v25 = vmul.f32 %v1671_v17, %v1112_v51  ;;  %v1297_v56 = vmul.f32 %v1672_v33, %v1112_v51  ;;  %v1694_v28 = vld [vmem:[#allocation2 + $0x2d8] sm:$0xff]  ;;  %v1695_v52 = vld [vmem:[#allocation2 + $0x300] sm:$0xff]  ;;  %v1696_v11 = vld [vmem:[#allocation2 + $0x308] sm:$0xff] }
 0x394   :  { %v1697_v33 = vld [vmem:[#allocation2 + $0x2f0] sm:$0xff] }
 0x395   :  { %1418 = vst [vmem:[#allocation5 + $0x210] sm:$0xff] %v1290_v53  ;;  %1419 = vst [vmem:[#allocation5 + $0x218] sm:$0xff] %v1291_v55 }
 0x396   :  { %1424 = vst [vmem:[#allocation5 + $0x240] sm:$0xff] %v1296_v25  ;;  %1425 = vst [vmem:[#allocation5 + $0x248] sm:$0xff] %v1297_v56  ;;  %v1108_v57 = vpop.permute.xlu1 %1107  ;;  %v1120_v22 = vpop.permute.xlu0 %1119 }
 0x397   :  { %v1294_v35 = vmul.f32 %v1673_v34, %v1108_v57  ;;  %v1295_v60 = vmul.f32 %v1674_v59, %v1108_v57  ;;  %v1300_v36 = vmul.f32 %v1675_v26, %v1120_v22  ;;  %v1301_v54 = vmul.f32 %v1676_v42, %v1120_v22  ;;  %v1698_v57 = vld [vmem:[#allocation2 + $0x2f8] sm:$0xff]  ;;  %v1699_v34 = vld [vmem:[#allocation2 + $0x320] sm:$0xff]  ;;  %v1700_v59 = vld [vmem:[#allocation2 + $0x328] sm:$0xff] }
 0x398   :  { %v1701_v42 = vld [vmem:[#allocation2 + $0x310] sm:$0xff] }
 0x399   :  { %1422 = vst [vmem:[#allocation5 + $0x230] sm:$0xff] %v1294_v35  ;;  %1423 = vst [vmem:[#allocation5 + $0x238] sm:$0xff] %v1295_v60 }
 0x39a   :  { %1428 = vst [vmem:[#allocation5 + $0x260] sm:$0xff] %v1300_v36  ;;  %1429 = vst [vmem:[#allocation5 + $0x268] sm:$0xff] %v1301_v54  ;;  %v1116_v43 = vpop.permute.xlu1 %1115  ;;  %v1128_v10 = vpop.permute.xlu0 %1127 }
 0x39b   :  { %v1298_v24 = vmul.f32 %v1677_v12, %v1116_v43  ;;  %v1299_v7 = vmul.f32 %v1678_v61, %v1116_v43  ;;  %v1304_v23 = vmul.f32 %v1679_v37, %v1128_v10  ;;  %v1305_v8 = vmul.f32 %v1680_v30, %v1128_v10  ;;  %v1702_v43 = vld [vmem:[#allocation2 + $0x318] sm:$0xff]  ;;  %v1703_v12 = vld [vmem:[#allocation2 + $0x340] sm:$0xff]  ;;  %v1704_v61 = vld [vmem:[#allocation2 + $0x348] sm:$0xff] }
 0x39c   :  { %v1705_v30 = vld [vmem:[#allocation2 + $0x330] sm:$0xff] }
 0x39d   :  { %1426 = vst [vmem:[#allocation5 + $0x250] sm:$0xff] %v1298_v24  ;;  %1427 = vst [vmem:[#allocation5 + $0x258] sm:$0xff] %v1299_v7 }
 0x39e   :  { %1432 = vst [vmem:[#allocation5 + $0x280] sm:$0xff] %v1304_v23  ;;  %1433 = vst [vmem:[#allocation5 + $0x288] sm:$0xff] %v1305_v8  ;;  %v1124_v62 = vpop.permute.xlu1 %1123  ;;  %v1136_v19 = vpop.permute.xlu0 %1135 }
 0x39f   :  { %v1302_v13 = vmul.f32 %v1681_v58, %v1124_v62  ;;  %v1303_v63 = vmul.f32 %v1682_v21, %v1124_v62  ;;  %v1308_v49 = vmul.f32 %v1683_v9, %v1136_v19  ;;  %v1309_v1 = vmul.f32 %v1684_v0, %v1136_v19  ;;  %v1706_v62 = vld [vmem:[#allocation2 + $0x338] sm:$0xff]  ;;  %v1707_v58 = vld [vmem:[#allocation2 + $0x360] sm:$0xff]  ;;  %v1708_v21 = vld [vmem:[#allocation2 + $0x368] sm:$0xff] }
 0x3a0   :  { %v1709_v0 = vld [vmem:[#allocation2 + $0x350] sm:$0xff] }
 0x3a1   :  { %1430 = vst [vmem:[#allocation5 + $0x270] sm:$0xff] %v1302_v13  ;;  %1431 = vst [vmem:[#allocation5 + $0x278] sm:$0xff] %v1303_v63 }
 0x3a2   :  { %1436 = vst [vmem:[#allocation5 + $0x2a0] sm:$0xff] %v1308_v49  ;;  %1437 = vst [vmem:[#allocation5 + $0x2a8] sm:$0xff] %v1309_v1  ;;  %v1132_v14 = vpop.permute.xlu1 %1131  ;;  %v1144_v31 = vpop.permute.xlu0 %1143 }
 0x3a3   :  { %v1306_v3 = vmul.f32 %v1685_v2, %v1132_v14  ;;  %v1307_v4 = vmul.f32 %v1686_v38, %v1132_v14  ;;  %v1312_v41 = vmul.f32 %v1687_v15, %v1144_v31  ;;  %v1313_v44 = vmul.f32 %v1688_v27, %v1144_v31  ;;  %v1710_v14 = vld [vmem:[#allocation2 + $0x358] sm:$0xff]  ;;  %v1711_v2 = vld [vmem:[#allocation2 + $0x380] sm:$0xff]  ;;  %v1712_v38 = vld [vmem:[#allocation2 + $0x388] sm:$0xff] }
 0x3a4   :  { %v1713_v27 = vld [vmem:[#allocation2 + $0x370] sm:$0xff] }
 0x3a5   :  { %1434 = vst [vmem:[#allocation5 + $0x290] sm:$0xff] %v1306_v3  ;;  %1435 = vst [vmem:[#allocation5 + $0x298] sm:$0xff] %v1307_v4 }
 0x3a6   :  { %1440 = vst [vmem:[#allocation5 + $0x2c0] sm:$0xff] %v1312_v41  ;;  %1441 = vst [vmem:[#allocation5 + $0x2c8] sm:$0xff] %v1313_v44  ;;  %v1140_v18 = vpop.permute.xlu1 %1139  ;;  %v1152_v40 = vpop.permute.xlu0 %1151 }
 0x3a7   :  { %v1310_v6 = vmul.f32 %v1689_v5, %v1140_v18  ;;  %v1311_v45 = vmul.f32 %v1690_v32, %v1140_v18  ;;  %v1316_v20 = vmul.f32 %v1691_v46, %v1152_v40  ;;  %v1317_v47 = vmul.f32 %v1692_v29, %v1152_v40  ;;  %v1714_v18 = vld [vmem:[#allocation2 + $0x378] sm:$0xff]  ;;  %v1715_v5 = vld [vmem:[#allocation2 + $0x3a0] sm:$0xff]  ;;  %v1716_v32 = vld [vmem:[#allocation2 + $0x3a8] sm:$0xff] }
 0x3a8   :  { %v1717_v29 = vld [vmem:[#allocation2 + $0x390] sm:$0xff] }
 0x3a9   :  { %1438 = vst [vmem:[#allocation5 + $0x2b0] sm:$0xff] %v1310_v6  ;;  %1439 = vst [vmem:[#allocation5 + $0x2b8] sm:$0xff] %v1311_v45 }
 0x3aa   :  { %1444 = vst [vmem:[#allocation5 + $0x2e0] sm:$0xff] %v1316_v20  ;;  %1445 = vst [vmem:[#allocation5 + $0x2e8] sm:$0xff] %v1317_v47  ;;  %v1148_v39 = vpop.permute.xlu1 %1147  ;;  %v1163_v48 = vpop.permute.xlu0 %1162 }
 0x3ab   :  { %v1314_v50 = vmul.f32 %v1693_v16, %v1148_v39  ;;  %v1315_v51 = vmul.f32 %v1694_v28, %v1148_v39  ;;  %v1320_v53 = vmul.f32 %v1695_v52, %v1163_v48  ;;  %v1321_v55 = vmul.f32 %v1696_v11, %v1163_v48  ;;  %v1718_v39 = vld [vmem:[#allocation2 + $0x398] sm:$0xff]  ;;  %v1719_v16 = vld [vmem:[#allocation2 + $0x3c0] sm:$0xff]  ;;  %v1720_v28 = vld [vmem:[#allocation2 + $0x3c8] sm:$0xff] }
 0x3ac   :  { %v1721_v11 = vld [vmem:[#allocation2 + $0x3b0] sm:$0xff] }
 0x3ad   :  { %1442 = vst [vmem:[#allocation5 + $0x2d0] sm:$0xff] %v1314_v50  ;;  %1443 = vst [vmem:[#allocation5 + $0x2d8] sm:$0xff] %v1315_v51 }
 0x3ae   :  { %1448 = vst [vmem:[#allocation5 + $0x300] sm:$0xff] %v1320_v53  ;;  %1449 = vst [vmem:[#allocation5 + $0x308] sm:$0xff] %v1321_v55  ;;  %v1156_v17 = vpop.permute.xlu1 %1155  ;;  %v1171_v25 = vpop.permute.xlu0 %1170 }
 0x3af   :  { %v1318_v56 = vmul.f32 %v1697_v33, %v1156_v17  ;;  %v1319_v22 = vmul.f32 %v1698_v57, %v1156_v17  ;;  %v1324_v35 = vmul.f32 %v1699_v34, %v1171_v25  ;;  %v1325_v60 = vmul.f32 %v1700_v59, %v1171_v25  ;;  %v1722_v17 = vld [vmem:[#allocation2 + $0x3b8] sm:$0xff]  ;;  %v1723_v33 = vld [vmem:[#allocation2 + $0x3e0] sm:$0xff]  ;;  %v1724_v57 = vld [vmem:[#allocation2 + $0x3e8] sm:$0xff] }
 0x3b1   :  { %1446 = vst [vmem:[#allocation5 + $0x2f0] sm:$0xff] %v1318_v56  ;;  %1447 = vst [vmem:[#allocation5 + $0x2f8] sm:$0xff] %v1319_v22 }
 0x3b2   :  { %1452 = vst [vmem:[#allocation5 + $0x320] sm:$0xff] %v1324_v35  ;;  %1453 = vst [vmem:[#allocation5 + $0x328] sm:$0xff] %v1325_v60  ;;  %v1167_v26 = vpop.permute.xlu1 %1166  ;;  %v1179_v36 = vpop.permute.xlu0 %1178  ;;  %v1725_v35 = vld [vmem:[#allocation2 + $0x3d0] sm:$0xff]  ;;  %v1726_v60 = vld [vmem:[#allocation2 + $0x3d8] sm:$0xff] }
 0x3b3   :  { %v1322_v54 = vmul.f32 %v1701_v42, %v1167_v26  ;;  %v1323_v10 = vmul.f32 %v1702_v43, %v1167_v26  ;;  %v1328_v24 = vmul.f32 %v1703_v12, %v1179_v36  ;;  %v1329_v7 = vmul.f32 %v1704_v61, %v1179_v36  ;;  %v1727_v42 = vld [vmem:[#allocation2 + $0x3f0] sm:$0xff]  ;;  %v1728_v43 = vld [vmem:[#allocation2 + $0x3f8] sm:$0xff] }
 0x3b5   :  { %1450 = vst [vmem:[#allocation5 + $0x310] sm:$0xff] %v1322_v54  ;;  %1451 = vst [vmem:[#allocation5 + $0x318] sm:$0xff] %v1323_v10 }
 0x3b6   :  { %1456 = vst [vmem:[#allocation5 + $0x340] sm:$0xff] %v1328_v24  ;;  %1457 = vst [vmem:[#allocation5 + $0x348] sm:$0xff] %v1329_v7  ;;  %v1175_v37 = vpop.permute.xlu1 %1174  ;;  %v1187_v23 = vpop.permute.xlu0 %1186 }
 0x3b7   :  { %v1326_v8 = vmul.f32 %v1705_v30, %v1175_v37  ;;  %v1327_v19 = vmul.f32 %v1706_v62, %v1175_v37  ;;  %v1332_v13 = vmul.f32 %v1707_v58, %v1187_v23  ;;  %v1333_v63 = vmul.f32 %v1708_v21, %v1187_v23 }
 0x3b9   :  { %1454 = vst [vmem:[#allocation5 + $0x330] sm:$0xff] %v1326_v8  ;;  %1455 = vst [vmem:[#allocation5 + $0x338] sm:$0xff] %v1327_v19 }
 0x3ba   :  { %1460 = vst [vmem:[#allocation5 + $0x360] sm:$0xff] %v1332_v13  ;;  %1461 = vst [vmem:[#allocation5 + $0x368] sm:$0xff] %v1333_v63  ;;  %v1183_v9 = vpop.permute.xlu1 %1182  ;;  %v1195_v49 = vpop.permute.xlu0 %1194 }
 0x3bb   :  { %v1330_v1 = vmul.f32 %v1709_v0, %v1183_v9  ;;  %v1331_v31 = vmul.f32 %v1710_v14, %v1183_v9  ;;  %v1336_v3 = vmul.f32 %v1711_v2, %v1195_v49  ;;  %v1337_v4 = vmul.f32 %v1712_v38, %v1195_v49 }
 0x3bd   :  { %1458 = vst [vmem:[#allocation5 + $0x350] sm:$0xff] %v1330_v1  ;;  %1459 = vst [vmem:[#allocation5 + $0x358] sm:$0xff] %v1331_v31 }
 0x3be   :  { %1464 = vst [vmem:[#allocation5 + $0x380] sm:$0xff] %v1336_v3  ;;  %1465 = vst [vmem:[#allocation5 + $0x388] sm:$0xff] %v1337_v4  ;;  %v1191_v15 = vpop.permute.xlu1 %1190  ;;  %v1203_v41 = vpop.permute.xlu0 %1202 }
 0x3bf   :  { %v1334_v44 = vmul.f32 %v1713_v27, %v1191_v15  ;;  %v1335_v40 = vmul.f32 %v1714_v18, %v1191_v15  ;;  %v1340_v6 = vmul.f32 %v1715_v5, %v1203_v41  ;;  %v1341_v45 = vmul.f32 %v1716_v32, %v1203_v41 }
 0x3c1   :  { %1462 = vst [vmem:[#allocation5 + $0x370] sm:$0xff] %v1334_v44  ;;  %1463 = vst [vmem:[#allocation5 + $0x378] sm:$0xff] %v1335_v40 }
 0x3c2   :  { %1468 = vst [vmem:[#allocation5 + $0x3a0] sm:$0xff] %v1340_v6  ;;  %1469 = vst [vmem:[#allocation5 + $0x3a8] sm:$0xff] %v1341_v45  ;;  %v1199_v46 = vpop.permute.xlu1 %1198  ;;  %v1211_v20 = vpop.permute.xlu0 %1210 }
 0x3c3   :  { %v1338_v47 = vmul.f32 %v1717_v29, %v1199_v46  ;;  %v1339_v48 = vmul.f32 %v1718_v39, %v1199_v46  ;;  %v1344_v50 = vmul.f32 %v1719_v16, %v1211_v20  ;;  %v1345_v51 = vmul.f32 %v1720_v28, %v1211_v20 }
 0x3c5   :  { %1466 = vst [vmem:[#allocation5 + $0x390] sm:$0xff] %v1338_v47  ;;  %1467 = vst [vmem:[#allocation5 + $0x398] sm:$0xff] %v1339_v48 }
 0x3c6   :  { %1472 = vst [vmem:[#allocation5 + $0x3c0] sm:$0xff] %v1344_v50  ;;  %1473 = vst [vmem:[#allocation5 + $0x3c8] sm:$0xff] %v1345_v51  ;;  %v1207_v52 = vpop.permute.xlu1 %1206  ;;  %v1219_v53 = vpop.permute.xlu0 %1218 }
 0x3c7   :  { %v1342_v55 = vmul.f32 %v1721_v11, %v1207_v52  ;;  %v1343_v25 = vmul.f32 %v1722_v17, %v1207_v52  ;;  %v1348_v56 = vmul.f32 %v1723_v33, %v1219_v53  ;;  %v1349_v22 = vmul.f32 %v1724_v57, %v1219_v53 }
 0x3c9   :  { %1470 = vst [vmem:[#allocation5 + $0x3b0] sm:$0xff] %v1342_v55  ;;  %1471 = vst [vmem:[#allocation5 + $0x3b8] sm:$0xff] %v1343_v25 }
 0x3ca   :  { %1476 = vst [vmem:[#allocation5 + $0x3e0] sm:$0xff] %v1348_v56  ;;  %1477 = vst [vmem:[#allocation5 + $0x3e8] sm:$0xff] %v1349_v22  ;;  %v1215_v34 = vpop.permute.xlu1 %1214 }
 0x3cb   :  { %v1346_v59 = vmul.f32 %v1725_v35, %v1215_v34  ;;  %v1347_v26 = vmul.f32 %v1726_v60, %v1215_v34 }
 0x3cd   :  { %1474 = vst [vmem:[#allocation5 + $0x3d0] sm:$0xff] %v1346_v59  ;;  %1475 = vst [vmem:[#allocation5 + $0x3d8] sm:$0xff] %v1347_v26 }
 0x3ce   :  { %v1223_v36 = vpop.permute.xlu1 %1222 }
 0x3cf   :  { %v1350_v54 = vmul.f32 %v1727_v42, %v1223_v36  ;;  %v1351_v10 = vmul.f32 %v1728_v43, %v1223_v36 }
 0x3d1   :  { %1478 = vst [vmem:[#allocation5 + $0x3f0] sm:$0xff] %v1350_v54  ;;  %1479 = vst [vmem:[#allocation5 + $0x3f8] sm:$0xff] %v1351_v10 }
 0x3d2   :  { %1762 = shalt.err (!%p1759_p12)
}
 0x3d3   :  { %s1763_s27 = scalar_lea.hbm %s2304_s5, 16384 }
 0x3d4   :  { %p1764_p13 = scmp.ne.s32.totalorder %s2304_s5, %s1763_s27  ;;  %p1767_p0 = scmp.lt.u32.totalorder %s1763_s27, %s2304_s5 }
 0x3d6   :  { %p1769_p1 = pnand %p1767_p0, %p1764_p13 }
 0x3d8   :  { %1772 = shalt.err (!%p1769_p1)
}
 0x3d9   :  { %1491 = dma.vmem_to_hbm [thread:$0]  %s1486_s3, 16384, %s2304_s5, [#allocation4], %s1778_s28, %s1778_s28, %s1779_s29  }
 0x3da   :  { %1775 = dma.done.wait [#allocation4], 16384  }
 0x3db   :  { %1776 = vsyncadd [#allocation4], 4294950912 }
 0x3dc   :  { %1495 = vsyncpa [#allocation3], 1 }
 0x3dd   :  { %1496 = vsyncpa [#allocation4], 1 }

</bundles_post_ra>
